<compile_context>
chip_gen: v7x
topology: tpu7x:2x2x1
jax: 0.10.0
libtpu: 0.0.40
codegen_flags: <defaults>
</compile_context>

<pallas_src>
import jax
import jax.numpy as jnp
from jax.experimental import pallas as pl
from jax.experimental.pallas import tpu as pltpu


# ----------------------------- fused Pallas kernel ---------------------------

def _make_fused_kernel(H, W, Cin, hidden, oup, stride, dilation,
                       expand, use_res):
    """Build the fused expand -> depthwise -> project kernel for one image."""
    pad = dilation
    eff_k = 2 * dilation + 1
    Ho = (H + 2 * pad - eff_k) // stride + 1
    Wo = (W + 2 * pad - eff_k) // stride + 1
    Hp, Wp = H + 2 * pad, W + 2 * pad

    def body(*refs):
        if expand:
            (x_ref, w1_ref, b1_ref, dw_ref, b2_ref, w3_ref, b3_ref,
             o_ref, hbuf, dbuf) = refs
        else:
            (x_ref, dw_ref, b2_ref, w3_ref, b3_ref,
             o_ref, hbuf, dbuf) = refs

        # -- stage 1: 1x1 expand (BN scale pre-folded into w1) + ReLU6.
        #    Result goes row by row into a zero-padded VMEM scratch, so the
        #    3x3 halo padding never exists in HBM and the expanded activation
        #    (largest tensor of the block) never round-trips HBM.
        hbuf[...] = jnp.zeros_like(hbuf)          # borders = conv zero padding
        x2d = x_ref[0]                            # (H*W, Cin), already in VMEM
        if expand:
            h = jnp.dot(x2d, w1_ref[...], preferred_element_type=jnp.float32)
            h = jnp.clip(h + b1_ref[...], 0.0, 6.0)           # (H*W, hidden)
        else:
            h = x2d                                           # hidden == Cin
        for r in range(H):
            hbuf[pad + r, pad:pad + W, :] = h[r * W:(r + 1) * W, :]

        # -- stage 2: 3x3 depthwise conv (BN scale pre-folded into the taps)
        #    + ReLU6, fully VMEM resident.  Strided tap reads use pl.ds so the
        #    stride-2 path loads directly instead of striding a loaded value.
        dwv = dw_ref[...]                                     # (9, hidden)
        acc = jnp.zeros((Ho, Wo, hidden), jnp.float32)
        for ky in range(3):
            for kx in range(3):
                h0, w0 = ky * dilation, kx * dilation
                if stride == 1:
                    xs = hbuf[h0:h0 + Ho, w0:w0 + Wo, :]
                else:
                    xs = hbuf[pl.ds(h0, Ho, stride), pl.ds(w0, Wo, stride), :]
                acc = acc + xs * dwv[ky * 3 + kx:ky * 3 + kx + 1, :]
        d = jnp.clip(acc + b2_ref[...], 0.0, 6.0)             # (Ho, Wo, hidden)

        # (Ho, Wo, hidden) -> (Ho*Wo, hidden) through the VMEM scratch; avoids
        # a minor-dim reshape relayout and keeps channels on the lane axis.
        for i in range(Ho):
            dbuf[i * Wo:(i + 1) * Wo, :] = d[i]

        # -- stage 3: 1x1 projection (BN scale pre-folded) + bias; the residual
        #    is added straight from the input block already resident in VMEM.
        y = jnp.dot(dbuf[...], w3_ref[...],
                    preferred_element_type=jnp.float32) + b3_ref[...]
        if use_res:
            y = y + x2d
        o_ref[0] = y                                          # (Ho*Wo, oup)

    return body, Ho, Wo, Hp, Wp


# ----------------------------- module -----------------------------------------

def _bn_fold(key, c, eps=1e-5):
    k1, k2, k3, k4 = jax.random.split(key, 4)
    gamma = 1.0 + 0.1 * jax.random.normal(k1, (c,), jnp.float32)
    beta = 0.1 * jax.random.normal(k2, (c,), jnp.float32)
    mean = 0.1 * jax.random.normal(k3, (c,), jnp.float32)
    var = 0.5 + jax.random.uniform(k4, (c,), jnp.float32)
    scale = gamma / jnp.sqrt(var + eps)
    bias = beta - mean * scale
    return scale.reshape(1, c), bias.reshape(1, c)


class InvertedResidualPallas:
    def __init__(self, key, inp, oup, stride, expand_ratio, dilation=1):
        assert stride in (1, 2)
        self.inp, self.oup = inp, oup
        self.stride, self.dilation = stride, dilation
        self.expand_ratio = expand_ratio
        hidden = int(round(inp * expand_ratio))
        self.hidden = hidden
        self.use_res_connect = (stride == 1 and inp == oup)

        keys = jax.random.split(key, 8)
        if expand_ratio != 1:
            self.w1 = 0.1 * jax.random.normal(keys[0], (inp, hidden), jnp.float32)
            self.s1, self.b1 = _bn_fold(keys[1], hidden)
            self.w1f = self.w1 * self.s1          # BN scale folded into conv
        else:
            self.w1 = None
        # depthwise weights stored flat as (9, hidden), tap = ky*3 + kx
        self.dw_flat = 0.1 * jax.random.normal(keys[2], (9, hidden), jnp.float32)
        self.s2, self.b2 = _bn_fold(keys[3], hidden)
        self.dwf = self.dw_flat * self.s2          # BN scale folded into taps
        self.w3 = 0.1 * jax.random.normal(keys[4], (hidden, oup), jnp.float32)
        self.s3, self.b3 = _bn_fold(keys[5], oup)
        self.w3f = self.w3 * self.s3               # BN scale folded into conv

    def __call__(self, x):  # x: NHWC float32
        n, h, w, cin = x.shape
        assert cin == self.inp
        expand = self.expand_ratio != 1
        kernel, ho, wo, hp, wp = _make_fused_kernel(
            h, w, cin, self.hidden, self.oup, self.stride, self.dilation,
            expand, self.use_res_connect)

        # Free metadata reshape: rows of the image on the second-minor axis,
        # channels on the lane axis.
        x2 = x.reshape(n, h * w, cin)

        in_specs = [pl.BlockSpec((1, h * w, cin), lambda i: (i, 0, 0))]
        args = [x2]
        if expand:
            in_specs += [pl.BlockSpec((cin, self.hidden), lambda i: (0, 0)),
                         pl.BlockSpec((1, self.hidden), lambda i: (0, 0))]
            args += [self.w1f, self.b1]
        in_specs += [pl.BlockSpec((9, self.hidden), lambda i: (0, 0)),
                     pl.BlockSpec((1, self.hidden), lambda i: (0, 0)),
                     pl.BlockSpec((self.hidden, self.oup), lambda i: (0, 0)),
                     pl.BlockSpec((1, self.oup), lambda i: (0, 0))]
        args += [self.dwf, self.b2, self.w3f, self.b3]

        out2 = pl.pallas_call(
            kernel,
            out_shape=jax.ShapeDtypeStruct((n, ho * wo, self.oup), jnp.float32),
            grid=(n,),
            in_specs=in_specs,
            out_specs=pl.BlockSpec((1, ho * wo, self.oup), lambda i: (i, 0, 0)),
            scratch_shapes=[
                pltpu.VMEM((hp, wp, self.hidden), jnp.float32),   # padded act.
                pltpu.VMEM((ho * wo, self.hidden), jnp.float32),  # dw output
            ],
            compiler_params=pltpu.CompilerParams(
                dimension_semantics=("parallel",)),
        )(*args)
        return out2.reshape(n, ho, wo, self.oup)


# ----------------------------- pure-JAX reference ----------------------------

def ref_forward(x, mod):
    h = x
    if mod.expand_ratio != 1:
        h = jnp.einsum('nhwc,cd->nhwd', x, mod.w1) * mod.s1 + mod.b1
        h = jnp.clip(h, 0.0, 6.0)
    pad = mod.dilation
    hp = jnp.pad(h, ((0, 0), (pad, pad), (pad, pad), (0, 0)))
    n, hh, ww, c = h.shape
    eff_k = 2 * mod.dilation + 1
    ho = (hh + 2 * pad - eff_k) // mod.stride + 1
    wo = (ww + 2 * pad - eff_k) // mod.stride + 1
    acc = jnp.zeros((n, ho, wo, c), jnp.float32)
    for ky in range(3):
        for kx in range(3):
            h0, w0 = ky * mod.dilation, kx * mod.dilation
            sl = hp[:, h0:h0 + (ho - 1) * mod.stride + 1:mod.stride,
                    w0:w0 + (wo - 1) * mod.stride + 1:mod.stride, :]
            acc = acc + sl * mod.dw_flat[ky * 3 + kx]
    d = jnp.clip(acc * mod.s2 + mod.b2, 0.0, 6.0)
    y = jnp.einsum('nhwc,cd->nhwd', d, mod.w3) * mod.s3 + mod.b3
    if mod.use_res_connect:
        y = y + x
    return y


# ----------------------------- main -------------------------------------------

if __name__ == "__main__":
    key = jax.random.PRNGKey(0)
    kx, kp = jax.random.split(key)

    # PyTorch-equivalent NCHW input would be (2, 8, 16, 16); we use NHWC.
    N, H, W, Cin = 2, 16, 16, 8
    x = jax.random.normal(kx, (N, H, W, Cin), jnp.float32)

    mod = InvertedResidualPallas(kp, inp=Cin, oup=Cin, stride=1,
                                 expand_ratio=4, dilation=1)

    out = jax.block_until_ready(mod(x))

    ref = ref_forward(x, mod)
    assert out.shape == ref.shape, (out.shape, ref.shape)
    max_err = float(jnp.max(jnp.abs(out - ref)))
    assert max_err < 1e-3, f"max abs error {max_err}"

    print("KERNEL_OK")
</pallas_src>

<mosaic_0001>
module attributes {stable_mosaic.version = 11 : i64} {
  func.func @body(%arg0: i32, %arg1: memref<1x256x8xf32, #tpu.memory_space<vmem>>, %arg2: memref<8x32xf32, #tpu.memory_space<vmem>>, %arg3: memref<1x32xf32, #tpu.memory_space<vmem>>, %arg4: memref<9x32xf32, #tpu.memory_space<vmem>>, %arg5: memref<1x32xf32, #tpu.memory_space<vmem>>, %arg6: memref<32x8xf32, #tpu.memory_space<vmem>>, %arg7: memref<1x8xf32, #tpu.memory_space<vmem>>, %arg8: memref<1x256x8xf32, #tpu.memory_space<vmem>>, %arg9: memref<18x18x32xf32, #tpu.memory_space<vmem>>, %arg10: memref<256x32xf32, #tpu.memory_space<vmem>>) attributes {dimension_semantics = [#tpu.dimension_semantics<parallel>], iteration_bounds = array<i64: 2>, scalar_prefetch = 0 : i64, scratch_operands = 2 : i64, tpu.core_type = #tpu.core_type<tc>, window_params = [{transform_indices = @transform_0, window_bounds = array<i64: 1, 256, 8>}, {pipeline_mode = #tpu.pipeline_mode<synchronous>, transform_indices = @transform_1, window_bounds = array<i64: 8, 32>}, {pipeline_mode = #tpu.pipeline_mode<synchronous>, transform_indices = @transform_2, window_bounds = array<i64: 1, 32>}, {pipeline_mode = #tpu.pipeline_mode<synchronous>, transform_indices = @transform_3, window_bounds = array<i64: 9, 32>}, {pipeline_mode = #tpu.pipeline_mode<synchronous>, transform_indices = @transform_4, window_bounds = array<i64: 1, 32>}, {pipeline_mode = #tpu.pipeline_mode<synchronous>, transform_indices = @transform_5, window_bounds = array<i64: 32, 8>}, {pipeline_mode = #tpu.pipeline_mode<synchronous>, transform_indices = @transform_6, window_bounds = array<i64: 1, 8>}, {transform_indices = @transform_7, window_bounds = array<i64: 1, 256, 8>}]} {
    %cst = arith.constant 0.000000e+00 : f32
    %0 = vector.broadcast %cst : f32 to vector<18x18x32xf32>
    %c0 = arith.constant 0 : index
    %c0_0 = arith.constant 0 : index
    %c0_1 = arith.constant 0 : index
    %1 = vector.load %arg9[%c0, %c0_0, %c0_1] : memref<18x18x32xf32, #tpu.memory_space<vmem>>, vector<18x18x32xf32>
    tpu.vector_store %arg9[%c0, %c0_0, %c0_1], %0 {strides = array<i32>} : memref<18x18x32xf32, #tpu.memory_space<vmem>>, vector<18x18x32xf32>,
    %c0_2 = arith.constant 0 : index
    %c0_3 = arith.constant 0 : index
    %c0_4 = arith.constant 0 : index
    %2 = vector.load %arg1[%c0_2, %c0_3, %c0_4] : memref<1x256x8xf32, #tpu.memory_space<vmem>>, vector<1x256x8xf32>
    %3 = vector.shape_cast %2 : vector<1x256x8xf32> to vector<256x8xf32>
    %c0_5 = arith.constant 0 : index
    %c0_6 = arith.constant 0 : index
    %4 = vector.load %arg2[%c0_5, %c0_6] : memref<8x32xf32, #tpu.memory_space<vmem>>, vector<8x32xf32>
    %cst_7 = arith.constant dense<0.000000e+00> : vector<256x32xf32>
    %5 = tpu.matmul %3, %4, %cst_7 {dimension_numbers = #tpu.dot_dimension_numbers<[1], [0], [0], [1], [0, 0, 1, 1], [], []>} : vector<256x8xf32>, vector<8x32xf32>, vector<256x32xf32> -> vector<256x32xf32>
    %c0_8 = arith.constant 0 : index
    %c0_9 = arith.constant 0 : index
    %6 = vector.load %arg3[%c0_8, %c0_9] : memref<1x32xf32, #tpu.memory_space<vmem>>, vector<1x32xf32>
    %7 = vector.broadcast %6 : vector<1x32xf32> to vector<256x32xf32>
    %8 = arith.addf %5, %7 : vector<256x32xf32>
    %cst_10 = arith.constant 0.000000e+00 : f32
    %cst_11 = arith.constant 6.000000e+00 : f32
    %9 = vector.broadcast %cst_10 : f32 to vector<256x32xf32>
    %10 = arith.maximumf %9, %8 : vector<256x32xf32>
    %11 = vector.broadcast %cst_11 : f32 to vector<256x32xf32>
    %12 = arith.minimumf %11, %10 : vector<256x32xf32>
    %13 = vector.extract_strided_slice %12 {offsets = [0, 0], sizes = [16, 32], strides = [1, 1]} : vector<256x32xf32> to vector<16x32xf32>
    %c1 = arith.constant 1 : index
    %c1_12 = arith.constant 1 : index
    %c0_13 = arith.constant 0 : index
    %14 = vector.load %arg9[%c1, %c1_12, %c0_13] : memref<18x18x32xf32, #tpu.memory_space<vmem>>, vector<1x16x32xf32>
    %15 = vector.shape_cast %14 : vector<1x16x32xf32> to vector<16x32xf32>
    %16 = vector.shape_cast %13 : vector<16x32xf32> to vector<1x16x32xf32>
    tpu.vector_store %arg9[%c1, %c1_12, %c0_13], %16 {strides = array<i32>} : memref<18x18x32xf32, #tpu.memory_space<vmem>>, vector<1x16x32xf32>,
    %17 = vector.extract_strided_slice %12 {offsets = [16, 0], sizes = [16, 32], strides = [1, 1]} : vector<256x32xf32> to vector<16x32xf32>
    %c2 = arith.constant 2 : index
    %c1_14 = arith.constant 1 : index
    %c0_15 = arith.constant 0 : index
    %18 = vector.load %arg9[%c2, %c1_14, %c0_15] : memref<18x18x32xf32, #tpu.memory_space<vmem>>, vector<1x16x32xf32>
    %19 = vector.shape_cast %18 : vector<1x16x32xf32> to vector<16x32xf32>
    %20 = vector.shape_cast %17 : vector<16x32xf32> to vector<1x16x32xf32>
    tpu.vector_store %arg9[%c2, %c1_14, %c0_15], %20 {strides = array<i32>} : memref<18x18x32xf32, #tpu.memory_space<vmem>>, vector<1x16x32xf32>,
    %21 = vector.extract_strided_slice %12 {offsets = [32, 0], sizes = [16, 32], strides = [1, 1]} : vector<256x32xf32> to vector<16x32xf32>
    %c3 = arith.constant 3 : index
    %c1_16 = arith.constant 1 : index
    %c0_17 = arith.constant 0 : index
    %22 = vector.load %arg9[%c3, %c1_16, %c0_17] : memref<18x18x32xf32, #tpu.memory_space<vmem>>, vector<1x16x32xf32>
    %23 = vector.shape_cast %22 : vector<1x16x32xf32> to vector<16x32xf32>
    %24 = vector.shape_cast %21 : vector<16x32xf32> to vector<1x16x32xf32>
    tpu.vector_store %arg9[%c3, %c1_16, %c0_17], %24 {strides = array<i32>} : memref<18x18x32xf32, #tpu.memory_space<vmem>>, vector<1x16x32xf32>,
    %25 = vector.extract_strided_slice %12 {offsets = [48, 0], sizes = [16, 32], strides = [1, 1]} : vector<256x32xf32> to vector<16x32xf32>
    %c4 = arith.constant 4 : index
    %c1_18 = arith.constant 1 : index
    %c0_19 = arith.constant 0 : index
    %26 = vector.load %arg9[%c4, %c1_18, %c0_19] : memref<18x18x32xf32, #tpu.memory_space<vmem>>, vector<1x16x32xf32>
    %27 = vector.shape_cast %26 : vector<1x16x32xf32> to vector<16x32xf32>
    %28 = vector.shape_cast %25 : vector<16x32xf32> to vector<1x16x32xf32>
    tpu.vector_store %arg9[%c4, %c1_18, %c0_19], %28 {strides = array<i32>} : memref<18x18x32xf32, #tpu.memory_space<vmem>>, vector<1x16x32xf32>,
    %29 = vector.extract_strided_slice %12 {offsets = [64, 0], sizes = [16, 32], strides = [1, 1]} : vector<256x32xf32> to vector<16x32xf32>
    %c5 = arith.constant 5 : index
    %c1_20 = arith.constant 1 : index
    %c0_21 = arith.constant 0 : index
    %30 = vector.load %arg9[%c5, %c1_20, %c0_21] : memref<18x18x32xf32, #tpu.memory_space<vmem>>, vector<1x16x32xf32>
    %31 = vector.shape_cast %30 : vector<1x16x32xf32> to vector<16x32xf32>
    %32 = vector.shape_cast %29 : vector<16x32xf32> to vector<1x16x32xf32>
    tpu.vector_store %arg9[%c5, %c1_20, %c0_21], %32 {strides = array<i32>} : memref<18x18x32xf32, #tpu.memory_space<vmem>>, vector<1x16x32xf32>,
    %33 = vector.extract_strided_slice %12 {offsets = [80, 0], sizes = [16, 32], strides = [1, 1]} : vector<256x32xf32> to vector<16x32xf32>
    %c6 = arith.constant 6 : index
    %c1_22 = arith.constant 1 : index
    %c0_23 = arith.constant 0 : index
    %34 = vector.load %arg9[%c6, %c1_22, %c0_23] : memref<18x18x32xf32, #tpu.memory_space<vmem>>, vector<1x16x32xf32>
    %35 = vector.shape_cast %34 : vector<1x16x32xf32> to vector<16x32xf32>
    %36 = vector.shape_cast %33 : vector<16x32xf32> to vector<1x16x32xf32>
    tpu.vector_store %arg9[%c6, %c1_22, %c0_23], %36 {strides = array<i32>} : memref<18x18x32xf32, #tpu.memory_space<vmem>>, vector<1x16x32xf32>,
    %37 = vector.extract_strided_slice %12 {offsets = [96, 0], sizes = [16, 32], strides = [1, 1]} : vector<256x32xf32> to vector<16x32xf32>
    %c7 = arith.constant 7 : index
    %c1_24 = arith.constant 1 : index
    %c0_25 = arith.constant 0 : index
    %38 = vector.load %arg9[%c7, %c1_24, %c0_25] : memref<18x18x32xf32, #tpu.memory_space<vmem>>, vector<1x16x32xf32>
    %39 = vector.shape_cast %38 : vector<1x16x32xf32> to vector<16x32xf32>
    %40 = vector.shape_cast %37 : vector<16x32xf32> to vector<1x16x32xf32>
    tpu.vector_store %arg9[%c7, %c1_24, %c0_25], %40 {strides = array<i32>} : memref<18x18x32xf32, #tpu.memory_space<vmem>>, vector<1x16x32xf32>,
    %41 = vector.extract_strided_slice %12 {offsets = [112, 0], sizes = [16, 32], strides = [1, 1]} : vector<256x32xf32> to vector<16x32xf32>
    %c8 = arith.constant 8 : index
    %c1_26 = arith.constant 1 : index
    %c0_27 = arith.constant 0 : index
    %42 = vector.load %arg9[%c8, %c1_26, %c0_27] : memref<18x18x32xf32, #tpu.memory_space<vmem>>, vector<1x16x32xf32>
    %43 = vector.shape_cast %42 : vector<1x16x32xf32> to vector<16x32xf32>
    %44 = vector.shape_cast %41 : vector<16x32xf32> to vector<1x16x32xf32>
    tpu.vector_store %arg9[%c8, %c1_26, %c0_27], %44 {strides = array<i32>} : memref<18x18x32xf32, #tpu.memory_space<vmem>>, vector<1x16x32xf32>,
    %45 = vector.extract_strided_slice %12 {offsets = [128, 0], sizes = [16, 32], strides = [1, 1]} : vector<256x32xf32> to vector<16x32xf32>
    %c9 = arith.constant 9 : index
    %c1_28 = arith.constant 1 : index
    %c0_29 = arith.constant 0 : index
    %46 = vector.load %arg9[%c9, %c1_28, %c0_29] : memref<18x18x32xf32, #tpu.memory_space<vmem>>, vector<1x16x32xf32>
    %47 = vector.shape_cast %46 : vector<1x16x32xf32> to vector<16x32xf32>
    %48 = vector.shape_cast %45 : vector<16x32xf32> to vector<1x16x32xf32>
    tpu.vector_store %arg9[%c9, %c1_28, %c0_29], %48 {strides = array<i32>} : memref<18x18x32xf32, #tpu.memory_space<vmem>>, vector<1x16x32xf32>,
    %49 = vector.extract_strided_slice %12 {offsets = [144, 0], sizes = [16, 32], strides = [1, 1]} : vector<256x32xf32> to vector<16x32xf32>
    %c10 = arith.constant 10 : index
    %c1_30 = arith.constant 1 : index
    %c0_31 = arith.constant 0 : index
    %50 = vector.load %arg9[%c10, %c1_30, %c0_31] : memref<18x18x32xf32, #tpu.memory_space<vmem>>, vector<1x16x32xf32>
    %51 = vector.shape_cast %50 : vector<1x16x32xf32> to vector<16x32xf32>
    %52 = vector.shape_cast %49 : vector<16x32xf32> to vector<1x16x32xf32>
    tpu.vector_store %arg9[%c10, %c1_30, %c0_31], %52 {strides = array<i32>} : memref<18x18x32xf32, #tpu.memory_space<vmem>>, vector<1x16x32xf32>,
    %53 = vector.extract_strided_slice %12 {offsets = [160, 0], sizes = [16, 32], strides = [1, 1]} : vector<256x32xf32> to vector<16x32xf32>
    %c11 = arith.constant 11 : index
    %c1_32 = arith.constant 1 : index
    %c0_33 = arith.constant 0 : index
    %54 = vector.load %arg9[%c11, %c1_32, %c0_33] : memref<18x18x32xf32, #tpu.memory_space<vmem>>, vector<1x16x32xf32>
    %55 = vector.shape_cast %54 : vector<1x16x32xf32> to vector<16x32xf32>
    %56 = vector.shape_cast %53 : vector<16x32xf32> to vector<1x16x32xf32>
    tpu.vector_store %arg9[%c11, %c1_32, %c0_33], %56 {strides = array<i32>} : memref<18x18x32xf32, #tpu.memory_space<vmem>>, vector<1x16x32xf32>,
    %57 = vector.extract_strided_slice %12 {offsets = [176, 0], sizes = [16, 32], strides = [1, 1]} : vector<256x32xf32> to vector<16x32xf32>
    %c12 = arith.constant 12 : index
    %c1_34 = arith.constant 1 : index
    %c0_35 = arith.constant 0 : index
    %58 = vector.load %arg9[%c12, %c1_34, %c0_35] : memref<18x18x32xf32, #tpu.memory_space<vmem>>, vector<1x16x32xf32>
    %59 = vector.shape_cast %58 : vector<1x16x32xf32> to vector<16x32xf32>
    %60 = vector.shape_cast %57 : vector<16x32xf32> to vector<1x16x32xf32>
    tpu.vector_store %arg9[%c12, %c1_34, %c0_35], %60 {strides = array<i32>} : memref<18x18x32xf32, #tpu.memory_space<vmem>>, vector<1x16x32xf32>,
    %61 = vector.extract_strided_slice %12 {offsets = [192, 0], sizes = [16, 32], strides = [1, 1]} : vector<256x32xf32> to vector<16x32xf32>
    %c13 = arith.constant 13 : index
    %c1_36 = arith.constant 1 : index
    %c0_37 = arith.constant 0 : index
    %62 = vector.load %arg9[%c13, %c1_36, %c0_37] : memref<18x18x32xf32, #tpu.memory_space<vmem>>, vector<1x16x32xf32>
    %63 = vector.shape_cast %62 : vector<1x16x32xf32> to vector<16x32xf32>
    %64 = vector.shape_cast %61 : vector<16x32xf32> to vector<1x16x32xf32>
    tpu.vector_store %arg9[%c13, %c1_36, %c0_37], %64 {strides = array<i32>} : memref<18x18x32xf32, #tpu.memory_space<vmem>>, vector<1x16x32xf32>,
    %65 = vector.extract_strided_slice %12 {offsets = [208, 0], sizes = [16, 32], strides = [1, 1]} : vector<256x32xf32> to vector<16x32xf32>
    %c14 = arith.constant 14 : index
    %c1_38 = arith.constant 1 : index
    %c0_39 = arith.constant 0 : index
    %66 = vector.load %arg9[%c14, %c1_38, %c0_39] : memref<18x18x32xf32, #tpu.memory_space<vmem>>, vector<1x16x32xf32>
    %67 = vector.shape_cast %66 : vector<1x16x32xf32> to vector<16x32xf32>
    %68 = vector.shape_cast %65 : vector<16x32xf32> to vector<1x16x32xf32>
    tpu.vector_store %arg9[%c14, %c1_38, %c0_39], %68 {strides = array<i32>} : memref<18x18x32xf32, #tpu.memory_space<vmem>>, vector<1x16x32xf32>,
    %69 = vector.extract_strided_slice %12 {offsets = [224, 0], sizes = [16, 32], strides = [1, 1]} : vector<256x32xf32> to vector<16x32xf32>
    %c15 = arith.constant 15 : index
    %c1_40 = arith.constant 1 : index
    %c0_41 = arith.constant 0 : index
    %70 = vector.load %arg9[%c15, %c1_40, %c0_41] : memref<18x18x32xf32, #tpu.memory_space<vmem>>, vector<1x16x32xf32>
    %71 = vector.shape_cast %70 : vector<1x16x32xf32> to vector<16x32xf32>
    %72 = vector.shape_cast %69 : vector<16x32xf32> to vector<1x16x32xf32>
    tpu.vector_store %arg9[%c15, %c1_40, %c0_41], %72 {strides = array<i32>} : memref<18x18x32xf32, #tpu.memory_space<vmem>>, vector<1x16x32xf32>,
    %73 = vector.extract_strided_slice %12 {offsets = [240, 0], sizes = [16, 32], strides = [1, 1]} : vector<256x32xf32> to vector<16x32xf32>
    %c16 = arith.constant 16 : index
    %c1_42 = arith.constant 1 : index
    %c0_43 = arith.constant 0 : index
    %74 = vector.load %arg9[%c16, %c1_42, %c0_43] : memref<18x18x32xf32, #tpu.memory_space<vmem>>, vector<1x16x32xf32>
    %75 = vector.shape_cast %74 : vector<1x16x32xf32> to vector<16x32xf32>
    %76 = vector.shape_cast %73 : vector<16x32xf32> to vector<1x16x32xf32>
    tpu.vector_store %arg9[%c16, %c1_42, %c0_43], %76 {strides = array<i32>} : memref<18x18x32xf32, #tpu.memory_space<vmem>>, vector<1x16x32xf32>,
    %c0_44 = arith.constant 0 : index
    %c0_45 = arith.constant 0 : index
    %77 = vector.load %arg4[%c0_44, %c0_45] : memref<9x32xf32, #tpu.memory_space<vmem>>, vector<9x32xf32>
    %cst_46 = arith.constant 0.000000e+00 : f32
    %78 = vector.broadcast %cst_46 : f32 to vector<16x16x32xf32>
    %c0_47 = arith.constant 0 : index
    %c0_48 = arith.constant 0 : index
    %c0_49 = arith.constant 0 : index
    %79 = vector.load %arg9[%c0_47, %c0_48, %c0_49] : memref<18x18x32xf32, #tpu.memory_space<vmem>>, vector<16x16x32xf32>
    %80 = vector.extract_strided_slice %77 {offsets = [0, 0], sizes = [1, 32], strides = [1, 1]} : vector<9x32xf32> to vector<1x32xf32>
    %81 = vector.shape_cast %80 : vector<1x32xf32> to vector<1x1x32xf32>
    %82 = vector.broadcast %81 : vector<1x1x32xf32> to vector<16x16x32xf32>
    %83 = arith.mulf %79, %82 : vector<16x16x32xf32>
    %84 = arith.addf %78, %83 : vector<16x16x32xf32>
    %c0_50 = arith.constant 0 : index
    %c1_51 = arith.constant 1 : index
    %c0_52 = arith.constant 0 : index
    %85 = vector.load %arg9[%c0_50, %c1_51, %c0_52] : memref<18x18x32xf32, #tpu.memory_space<vmem>>, vector<16x16x32xf32>
    %86 = vector.extract_strided_slice %77 {offsets = [1, 0], sizes = [1, 32], strides = [1, 1]} : vector<9x32xf32> to vector<1x32xf32>
    %87 = vector.shape_cast %86 : vector<1x32xf32> to vector<1x1x32xf32>
    %88 = vector.broadcast %87 : vector<1x1x32xf32> to vector<16x16x32xf32>
    %89 = arith.mulf %85, %88 : vector<16x16x32xf32>
    %90 = arith.addf %84, %89 : vector<16x16x32xf32>
    %c0_53 = arith.constant 0 : index
    %c2_54 = arith.constant 2 : index
    %c0_55 = arith.constant 0 : index
    %91 = vector.load %arg9[%c0_53, %c2_54, %c0_55] : memref<18x18x32xf32, #tpu.memory_space<vmem>>, vector<16x16x32xf32>
    %92 = vector.extract_strided_slice %77 {offsets = [2, 0], sizes = [1, 32], strides = [1, 1]} : vector<9x32xf32> to vector<1x32xf32>
    %93 = vector.shape_cast %92 : vector<1x32xf32> to vector<1x1x32xf32>
    %94 = vector.broadcast %93 : vector<1x1x32xf32> to vector<16x16x32xf32>
    %95 = arith.mulf %91, %94 : vector<16x16x32xf32>
    %96 = arith.addf %90, %95 : vector<16x16x32xf32>
    %c1_56 = arith.constant 1 : index
    %c0_57 = arith.constant 0 : index
    %c0_58 = arith.constant 0 : index
    %97 = vector.load %arg9[%c1_56, %c0_57, %c0_58] : memref<18x18x32xf32, #tpu.memory_space<vmem>>, vector<16x16x32xf32>
    %98 = vector.extract_strided_slice %77 {offsets = [3, 0], sizes = [1, 32], strides = [1, 1]} : vector<9x32xf32> to vector<1x32xf32>
    %99 = vector.shape_cast %98 : vector<1x32xf32> to vector<1x1x32xf32>
    %100 = vector.broadcast %99 : vector<1x1x32xf32> to vector<16x16x32xf32>
    %101 = arith.mulf %97, %100 : vector<16x16x32xf32>
    %102 = arith.addf %96, %101 : vector<16x16x32xf32>
    %c1_59 = arith.constant 1 : index
    %c1_60 = arith.constant 1 : index
    %c0_61 = arith.constant 0 : index
    %103 = vector.load %arg9[%c1_59, %c1_60, %c0_61] : memref<18x18x32xf32, #tpu.memory_space<vmem>>, vector<16x16x32xf32>
    %104 = vector.extract_strided_slice %77 {offsets = [4, 0], sizes = [1, 32], strides = [1, 1]} : vector<9x32xf32> to vector<1x32xf32>
    %105 = vector.shape_cast %104 : vector<1x32xf32> to vector<1x1x32xf32>
    %106 = vector.broadcast %105 : vector<1x1x32xf32> to vector<16x16x32xf32>
    %107 = arith.mulf %103, %106 : vector<16x16x32xf32>
    %108 = arith.addf %102, %107 : vector<16x16x32xf32>
    %c1_62 = arith.constant 1 : index
    %c2_63 = arith.constant 2 : index
    %c0_64 = arith.constant 0 : index
    %109 = vector.load %arg9[%c1_62, %c2_63, %c0_64] : memref<18x18x32xf32, #tpu.memory_space<vmem>>, vector<16x16x32xf32>
    %110 = vector.extract_strided_slice %77 {offsets = [5, 0], sizes = [1, 32], strides = [1, 1]} : vector<9x32xf32> to vector<1x32xf32>
    %111 = vector.shape_cast %110 : vector<1x32xf32> to vector<1x1x32xf32>
    %112 = vector.broadcast %111 : vector<1x1x32xf32> to vector<16x16x32xf32>
    %113 = arith.mulf %109, %112 : vector<16x16x32xf32>
    %114 = arith.addf %108, %113 : vector<16x16x32xf32>
    %c2_65 = arith.constant 2 : index
    %c0_66 = arith.constant 0 : index
    %c0_67 = arith.constant 0 : index
    %115 = vector.load %arg9[%c2_65, %c0_66, %c0_67] : memref<18x18x32xf32, #tpu.memory_space<vmem>>, vector<16x16x32xf32>
    %116 = vector.extract_strided_slice %77 {offsets = [6, 0], sizes = [1, 32], strides = [1, 1]} : vector<9x32xf32> to vector<1x32xf32>
    %117 = vector.shape_cast %116 : vector<1x32xf32> to vector<1x1x32xf32>
    %118 = vector.broadcast %117 : vector<1x1x32xf32> to vector<16x16x32xf32>
    %119 = arith.mulf %115, %118 : vector<16x16x32xf32>
    %120 = arith.addf %114, %119 : vector<16x16x32xf32>
    %c2_68 = arith.constant 2 : index
    %c1_69 = arith.constant 1 : index
    %c0_70 = arith.constant 0 : index
    %121 = vector.load %arg9[%c2_68, %c1_69, %c0_70] : memref<18x18x32xf32, #tpu.memory_space<vmem>>, vector<16x16x32xf32>
    %122 = vector.extract_strided_slice %77 {offsets = [7, 0], sizes = [1, 32], strides = [1, 1]} : vector<9x32xf32> to vector<1x32xf32>
    %123 = vector.shape_cast %122 : vector<1x32xf32> to vector<1x1x32xf32>
    %124 = vector.broadcast %123 : vector<1x1x32xf32> to vector<16x16x32xf32>
    %125 = arith.mulf %121, %124 : vector<16x16x32xf32>
    %126 = arith.addf %120, %125 : vector<16x16x32xf32>
    %c2_71 = arith.constant 2 : index
    %c2_72 = arith.constant 2 : index
    %c0_73 = arith.constant 0 : index
    %127 = vector.load %arg9[%c2_71, %c2_72, %c0_73] : memref<18x18x32xf32, #tpu.memory_space<vmem>>, vector<16x16x32xf32>
    %128 = vector.extract_strided_slice %77 {offsets = [8, 0], sizes = [1, 32], strides = [1, 1]} : vector<9x32xf32> to vector<1x32xf32>
    %129 = vector.shape_cast %128 : vector<1x32xf32> to vector<1x1x32xf32>
    %130 = vector.broadcast %129 : vector<1x1x32xf32> to vector<16x16x32xf32>
    %131 = arith.mulf %127, %130 : vector<16x16x32xf32>
    %132 = arith.addf %126, %131 : vector<16x16x32xf32>
    %c0_74 = arith.constant 0 : index
    %c0_75 = arith.constant 0 : index
    %133 = vector.load %arg5[%c0_74, %c0_75] : memref<1x32xf32, #tpu.memory_space<vmem>>, vector<1x32xf32>
    %134 = vector.shape_cast %133 : vector<1x32xf32> to vector<1x1x32xf32>
    %135 = vector.broadcast %134 : vector<1x1x32xf32> to vector<16x16x32xf32>
    %136 = arith.addf %132, %135 : vector<16x16x32xf32>
    %cst_76 = arith.constant 0.000000e+00 : f32
    %cst_77 = arith.constant 6.000000e+00 : f32
    %137 = vector.broadcast %cst_76 : f32 to vector<16x16x32xf32>
    %138 = arith.maximumf %137, %136 : vector<16x16x32xf32>
    %139 = vector.broadcast %cst_77 : f32 to vector<16x16x32xf32>
    %140 = arith.minimumf %139, %138 : vector<16x16x32xf32>
    %141 = vector.extract_strided_slice %140 {offsets = [0, 0, 0], sizes = [1, 16, 32], strides = [1, 1, 1]} : vector<16x16x32xf32> to vector<1x16x32xf32>
    %142 = vector.shape_cast %141 : vector<1x16x32xf32> to vector<16x32xf32>
    %c0_78 = arith.constant 0 : index
    %c0_79 = arith.constant 0 : index
    %143 = vector.load %arg10[%c0_78, %c0_79] : memref<256x32xf32, #tpu.memory_space<vmem>>, vector<16x32xf32>
    tpu.vector_store %arg10[%c0_78, %c0_79], %142 {strides = array<i32>} : memref<256x32xf32, #tpu.memory_space<vmem>>, vector<16x32xf32>,
    %144 = vector.extract_strided_slice %140 {offsets = [1, 0, 0], sizes = [1, 16, 32], strides = [1, 1, 1]} : vector<16x16x32xf32> to vector<1x16x32xf32>
    %145 = vector.shape_cast %144 : vector<1x16x32xf32> to vector<16x32xf32>
    %c16_80 = arith.constant 16 : index
    %c0_81 = arith.constant 0 : index
    %146 = vector.load %arg10[%c16_80, %c0_81] : memref<256x32xf32, #tpu.memory_space<vmem>>, vector<16x32xf32>
    tpu.vector_store %arg10[%c16_80, %c0_81], %145 {strides = array<i32>} : memref<256x32xf32, #tpu.memory_space<vmem>>, vector<16x32xf32>,
    %147 = vector.extract_strided_slice %140 {offsets = [2, 0, 0], sizes = [1, 16, 32], strides = [1, 1, 1]} : vector<16x16x32xf32> to vector<1x16x32xf32>
    %148 = vector.shape_cast %147 : vector<1x16x32xf32> to vector<16x32xf32>
    %c32 = arith.constant 32 : index
    %c0_82 = arith.constant 0 : index
    %149 = vector.load %arg10[%c32, %c0_82] : memref<256x32xf32, #tpu.memory_space<vmem>>, vector<16x32xf32>
    tpu.vector_store %arg10[%c32, %c0_82], %148 {strides = array<i32>} : memref<256x32xf32, #tpu.memory_space<vmem>>, vector<16x32xf32>,
    %150 = vector.extract_strided_slice %140 {offsets = [3, 0, 0], sizes = [1, 16, 32], strides = [1, 1, 1]} : vector<16x16x32xf32> to vector<1x16x32xf32>
    %151 = vector.shape_cast %150 : vector<1x16x32xf32> to vector<16x32xf32>
    %c48 = arith.constant 48 : index
    %c0_83 = arith.constant 0 : index
    %152 = vector.load %arg10[%c48, %c0_83] : memref<256x32xf32, #tpu.memory_space<vmem>>, vector<16x32xf32>
    tpu.vector_store %arg10[%c48, %c0_83], %151 {strides = array<i32>} : memref<256x32xf32, #tpu.memory_space<vmem>>, vector<16x32xf32>,
    %153 = vector.extract_strided_slice %140 {offsets = [4, 0, 0], sizes = [1, 16, 32], strides = [1, 1, 1]} : vector<16x16x32xf32> to vector<1x16x32xf32>
    %154 = vector.shape_cast %153 : vector<1x16x32xf32> to vector<16x32xf32>
    %c64 = arith.constant 64 : index
    %c0_84 = arith.constant 0 : index
    %155 = vector.load %arg10[%c64, %c0_84] : memref<256x32xf32, #tpu.memory_space<vmem>>, vector<16x32xf32>
    tpu.vector_store %arg10[%c64, %c0_84], %154 {strides = array<i32>} : memref<256x32xf32, #tpu.memory_space<vmem>>, vector<16x32xf32>,
    %156 = vector.extract_strided_slice %140 {offsets = [5, 0, 0], sizes = [1, 16, 32], strides = [1, 1, 1]} : vector<16x16x32xf32> to vector<1x16x32xf32>
    %157 = vector.shape_cast %156 : vector<1x16x32xf32> to vector<16x32xf32>
    %c80 = arith.constant 80 : index
    %c0_85 = arith.constant 0 : index
    %158 = vector.load %arg10[%c80, %c0_85] : memref<256x32xf32, #tpu.memory_space<vmem>>, vector<16x32xf32>
    tpu.vector_store %arg10[%c80, %c0_85], %157 {strides = array<i32>} : memref<256x32xf32, #tpu.memory_space<vmem>>, vector<16x32xf32>,
    %159 = vector.extract_strided_slice %140 {offsets = [6, 0, 0], sizes = [1, 16, 32], strides = [1, 1, 1]} : vector<16x16x32xf32> to vector<1x16x32xf32>
    %160 = vector.shape_cast %159 : vector<1x16x32xf32> to vector<16x32xf32>
    %c96 = arith.constant 96 : index
    %c0_86 = arith.constant 0 : index
    %161 = vector.load %arg10[%c96, %c0_86] : memref<256x32xf32, #tpu.memory_space<vmem>>, vector<16x32xf32>
    tpu.vector_store %arg10[%c96, %c0_86], %160 {strides = array<i32>} : memref<256x32xf32, #tpu.memory_space<vmem>>, vector<16x32xf32>,
    %162 = vector.extract_strided_slice %140 {offsets = [7, 0, 0], sizes = [1, 16, 32], strides = [1, 1, 1]} : vector<16x16x32xf32> to vector<1x16x32xf32>
    %163 = vector.shape_cast %162 : vector<1x16x32xf32> to vector<16x32xf32>
    %c112 = arith.constant 112 : index
    %c0_87 = arith.constant 0 : index
    %164 = vector.load %arg10[%c112, %c0_87] : memref<256x32xf32, #tpu.memory_space<vmem>>, vector<16x32xf32>
    tpu.vector_store %arg10[%c112, %c0_87], %163 {strides = array<i32>} : memref<256x32xf32, #tpu.memory_space<vmem>>, vector<16x32xf32>,
    %165 = vector.extract_strided_slice %140 {offsets = [8, 0, 0], sizes = [1, 16, 32], strides = [1, 1, 1]} : vector<16x16x32xf32> to vector<1x16x32xf32>
    %166 = vector.shape_cast %165 : vector<1x16x32xf32> to vector<16x32xf32>
    %c128 = arith.constant 128 : index
    %c0_88 = arith.constant 0 : index
    %167 = vector.load %arg10[%c128, %c0_88] : memref<256x32xf32, #tpu.memory_space<vmem>>, vector<16x32xf32>
    tpu.vector_store %arg10[%c128, %c0_88], %166 {strides = array<i32>} : memref<256x32xf32, #tpu.memory_space<vmem>>, vector<16x32xf32>,
    %168 = vector.extract_strided_slice %140 {offsets = [9, 0, 0], sizes = [1, 16, 32], strides = [1, 1, 1]} : vector<16x16x32xf32> to vector<1x16x32xf32>
    %169 = vector.shape_cast %168 : vector<1x16x32xf32> to vector<16x32xf32>
    %c144 = arith.constant 144 : index
    %c0_89 = arith.constant 0 : index
    %170 = vector.load %arg10[%c144, %c0_89] : memref<256x32xf32, #tpu.memory_space<vmem>>, vector<16x32xf32>
    tpu.vector_store %arg10[%c144, %c0_89], %169 {strides = array<i32>} : memref<256x32xf32, #tpu.memory_space<vmem>>, vector<16x32xf32>,
    %171 = vector.extract_strided_slice %140 {offsets = [10, 0, 0], sizes = [1, 16, 32], strides = [1, 1, 1]} : vector<16x16x32xf32> to vector<1x16x32xf32>
    %172 = vector.shape_cast %171 : vector<1x16x32xf32> to vector<16x32xf32>
    %c160 = arith.constant 160 : index
    %c0_90 = arith.constant 0 : index
    %173 = vector.load %arg10[%c160, %c0_90] : memref<256x32xf32, #tpu.memory_space<vmem>>, vector<16x32xf32>
    tpu.vector_store %arg10[%c160, %c0_90], %172 {strides = array<i32>} : memref<256x32xf32, #tpu.memory_space<vmem>>, vector<16x32xf32>,
    %174 = vector.extract_strided_slice %140 {offsets = [11, 0, 0], sizes = [1, 16, 32], strides = [1, 1, 1]} : vector<16x16x32xf32> to vector<1x16x32xf32>
    %175 = vector.shape_cast %174 : vector<1x16x32xf32> to vector<16x32xf32>
    %c176 = arith.constant 176 : index
    %c0_91 = arith.constant 0 : index
    %176 = vector.load %arg10[%c176, %c0_91] : memref<256x32xf32, #tpu.memory_space<vmem>>, vector<16x32xf32>
    tpu.vector_store %arg10[%c176, %c0_91], %175 {strides = array<i32>} : memref<256x32xf32, #tpu.memory_space<vmem>>, vector<16x32xf32>,
    %177 = vector.extract_strided_slice %140 {offsets = [12, 0, 0], sizes = [1, 16, 32], strides = [1, 1, 1]} : vector<16x16x32xf32> to vector<1x16x32xf32>
    %178 = vector.shape_cast %177 : vector<1x16x32xf32> to vector<16x32xf32>
    %c192 = arith.constant 192 : index
    %c0_92 = arith.constant 0 : index
    %179 = vector.load %arg10[%c192, %c0_92] : memref<256x32xf32, #tpu.memory_space<vmem>>, vector<16x32xf32>
    tpu.vector_store %arg10[%c192, %c0_92], %178 {strides = array<i32>} : memref<256x32xf32, #tpu.memory_space<vmem>>, vector<16x32xf32>,
    %180 = vector.extract_strided_slice %140 {offsets = [13, 0, 0], sizes = [1, 16, 32], strides = [1, 1, 1]} : vector<16x16x32xf32> to vector<1x16x32xf32>
    %181 = vector.shape_cast %180 : vector<1x16x32xf32> to vector<16x32xf32>
    %c208 = arith.constant 208 : index
    %c0_93 = arith.constant 0 : index
    %182 = vector.load %arg10[%c208, %c0_93] : memref<256x32xf32, #tpu.memory_space<vmem>>, vector<16x32xf32>
    tpu.vector_store %arg10[%c208, %c0_93], %181 {strides = array<i32>} : memref<256x32xf32, #tpu.memory_space<vmem>>, vector<16x32xf32>,
    %183 = vector.extract_strided_slice %140 {offsets = [14, 0, 0], sizes = [1, 16, 32], strides = [1, 1, 1]} : vector<16x16x32xf32> to vector<1x16x32xf32>
    %184 = vector.shape_cast %183 : vector<1x16x32xf32> to vector<16x32xf32>
    %c224 = arith.constant 224 : index
    %c0_94 = arith.constant 0 : index
    %185 = vector.load %arg10[%c224, %c0_94] : memref<256x32xf32, #tpu.memory_space<vmem>>, vector<16x32xf32>
    tpu.vector_store %arg10[%c224, %c0_94], %184 {strides = array<i32>} : memref<256x32xf32, #tpu.memory_space<vmem>>, vector<16x32xf32>,
    %186 = vector.extract_strided_slice %140 {offsets = [15, 0, 0], sizes = [1, 16, 32], strides = [1, 1, 1]} : vector<16x16x32xf32> to vector<1x16x32xf32>
    %187 = vector.shape_cast %186 : vector<1x16x32xf32> to vector<16x32xf32>
    %c240 = arith.constant 240 : index
    %c0_95 = arith.constant 0 : index
    %188 = vector.load %arg10[%c240, %c0_95] : memref<256x32xf32, #tpu.memory_space<vmem>>, vector<16x32xf32>
    tpu.vector_store %arg10[%c240, %c0_95], %187 {strides = array<i32>} : memref<256x32xf32, #tpu.memory_space<vmem>>, vector<16x32xf32>,
    %c0_96 = arith.constant 0 : index
    %c0_97 = arith.constant 0 : index
    %189 = vector.load %arg10[%c0_96, %c0_97] : memref<256x32xf32, #tpu.memory_space<vmem>>, vector<256x32xf32>
    %c0_98 = arith.constant 0 : index
    %c0_99 = arith.constant 0 : index
    %190 = vector.load %arg6[%c0_98, %c0_99] : memref<32x8xf32, #tpu.memory_space<vmem>>, vector<32x8xf32>
    %cst_100 = arith.constant dense<0.000000e+00> : vector<256x8xf32>
    %191 = tpu.matmul %189, %190, %cst_100 {dimension_numbers = #tpu.dot_dimension_numbers<[1], [0], [0], [1], [0, 0, 1, 1], [], []>} : vector<256x32xf32>, vector<32x8xf32>, vector<256x8xf32> -> vector<256x8xf32>
    %c0_101 = arith.constant 0 : index
    %c0_102 = arith.constant 0 : index
    %192 = vector.load %arg7[%c0_101, %c0_102] : memref<1x8xf32, #tpu.memory_space<vmem>>, vector<1x8xf32>
    %193 = vector.broadcast %192 : vector<1x8xf32> to vector<256x8xf32>
    %194 = arith.addf %191, %193 : vector<256x8xf32>
    %195 = arith.addf %194, %3 : vector<256x8xf32>
    %c0_103 = arith.constant 0 : index
    %c0_104 = arith.constant 0 : index
    %c0_105 = arith.constant 0 : index
    %196 = vector.load %arg8[%c0_103, %c0_104, %c0_105] : memref<1x256x8xf32, #tpu.memory_space<vmem>>, vector<1x256x8xf32>
    %197 = vector.shape_cast %196 : vector<1x256x8xf32> to vector<256x8xf32>
    %198 = vector.shape_cast %195 : vector<256x8xf32> to vector<1x256x8xf32>
    tpu.vector_store %arg8[%c0_103, %c0_104, %c0_105], %198 {strides = array<i32>} : memref<1x256x8xf32, #tpu.memory_space<vmem>>, vector<1x256x8xf32>,
    return
  }
  func.func @transform_0(%arg0: i32) -> (i32, i32, i32) {
    %c0_i32 = arith.constant 0 : i32
    %c0_i32_0 = arith.constant 0 : i32
    %c0_i32_1 = arith.constant 0 : i32
    return %arg0, %c0_i32, %c0_i32_0 : i32, i32, i32
  }
  func.func @transform_1(%arg0: i32) -> (i32, i32) {
    %c0_i32 = arith.constant 0 : i32
    %c0_i32_0 = arith.constant 0 : i32
    %c0_i32_1 = arith.constant 0 : i32
    return %c0_i32, %c0_i32_0 : i32, i32
  }
  func.func @transform_2(%arg0: i32) -> (i32, i32) {
    %c0_i32 = arith.constant 0 : i32
    %c0_i32_0 = arith.constant 0 : i32
    %c0_i32_1 = arith.constant 0 : i32
    return %c0_i32, %c0_i32_0 : i32, i32
  }
  func.func @transform_3(%arg0: i32) -> (i32, i32) {
    %c0_i32 = arith.constant 0 : i32
    %c0_i32_0 = arith.constant 0 : i32
    %c0_i32_1 = arith.constant 0 : i32
    return %c0_i32, %c0_i32_0 : i32, i32
  }
  func.func @transform_4(%arg0: i32) -> (i32, i32) {
    %c0_i32 = arith.constant 0 : i32
    %c0_i32_0 = arith.constant 0 : i32
    %c0_i32_1 = arith.constant 0 : i32
    return %c0_i32, %c0_i32_0 : i32, i32
  }
  func.func @transform_5(%arg0: i32) -> (i32, i32) {
    %c0_i32 = arith.constant 0 : i32
    %c0_i32_0 = arith.constant 0 : i32
    %c0_i32_1 = arith.constant 0 : i32
    return %c0_i32, %c0_i32_0 : i32, i32
  }
  func.func @transform_6(%arg0: i32) -> (i32, i32) {
    %c0_i32 = arith.constant 0 : i32
    %c0_i32_0 = arith.constant 0 : i32
    %c0_i32_1 = arith.constant 0 : i32
    return %c0_i32, %c0_i32_0 : i32, i32
  }
  func.func @transform_7(%arg0: i32) -> (i32, i32, i32) {
    %c0_i32 = arith.constant 0 : i32
    %c0_i32_0 = arith.constant 0 : i32
    %c0_i32_1 = arith.constant 0 : i32
    return %arg0, %c0_i32, %c0_i32_0 : i32, i32, i32
  }
}

</mosaic_0001>

<bundles_post_ra>
// kernel: tpu_custom_call.1
= control target key start
LH: loop header
LB: loop body
LE: loop exit
PB: predicated region body
PF: predicated region fallthrough
CT: control target
= control target key end

     0   :  { %s2686_s24 = smov 0   ;;  %s4161_s0 = inlined_call_operand.vmem [shape: f32[2,256,8], index: 0, kind: input, shape index: {}]   ;;  %s4162_s1 = inlined_call_operand.vmem [shape: f32[8,32], index: 1, kind: input, shape index: {}]   ;;  %s4163_s2 = inlined_call_operand.vmem [shape: f32[1,32], index: 2, kind: input, shape index: {}]   ;;  %s4164_s3 = inlined_call_operand.vmem [shape: f32[9,32], index: 3, kind: input, shape index: {}]   ;;  %s4165_s4 = inlined_call_operand.vmem [shape: f32[1,32], index: 4, kind: input, shape index: {}]   ;;  %s4166_s5 = inlined_call_operand.vmem [shape: f32[32,8], index: 5, kind: input, shape index: {}]   ;;  %s4167_s6 = inlined_call_operand.vmem [shape: f32[1,8], index: 6, kind: input, shape index: {}]   ;;  %s4168_s7 = inlined_call_operand.vmem [shape: f32[2,256,8], index: 7, kind: output, shape index: {}]  }
   0x1 LB: > { %s2329_s25 = sadd.s32 4294967295, %s2643_s24   ;;  %p2333_p0 = scmp.ge.s32.totalorder %s2643_s24, 1  ;;  %s2643_s24 = sphi %s2686_s24, %s17_s24  }
   0x2   : > { %p237_p1 = scmp.lt.s32.totalorder %s2643_s24, 3 }
   0x4   : > { %p238_p2 = pnand %p2333_p0, %p237_p1 }
   0x6   : > { %241 = sbr.rel (%p238_p2) target bundleno = 672 (0x2a0), region = 48 }
   0xd   : > { %v367_v0 = vld [vmem:[%s4162_s1] sm:$0xff]  ;;  %p2699_p3 = scmp.lt.s32.totalorder %s2329_s25, 1  ;;  %vm279_vm0 = vcmask 261120   ;;  %vm282_vm1 = vcmask 254976   ;;  %v2645_v1 = vmov 0.0   ;;  %vm375_vm2 = vcmask 64512  }
   0xe   : > { %2479 = vmatprep.subr.mxu0 %v367_v0  ;;  %285 = vst.msk [vmem:[#allocation2 + $0x20] sm:$0xff] %vm279_vm0, %v2645_v1  ;;  %280 = vst.msk [vmem:[#allocation2] sm:$0xff] %vm279_vm0, %v2645_v1  ;;  %v1878_v34 = vld [vmem:[%s4166_s5] sm:$0xff]  ;;  %v1879_v35 = vld [vmem:[%s4166_s5 + $0x8] sm:$0xff]  ;;  %v843_v40 = vlaneseq }
   0xf   : > { %286 = vst.msk [vmem:[#allocation2 + $0x28] sm:$0x3] %vm282_vm1, %v2645_v1  ;;  %283 = vst.msk [vmem:[#allocation2 + $0x10] sm:$0x3] %vm282_vm1, %v2645_v1  ;;  %2480 = vmatpush3.msra.mxu0 %v367_v0  ;;  %s4365_s25 = smov (!%p2699_p3, %s2329_s25), 1  ;;  %v2585_v36 = vpack.c.bf16 %v1879_v35, %v1878_v34  ;;  %v1880_v37 = vld [vmem:[%s4166_s5 + $0x10] sm:$0xff] }
  0x10   : > { %281 = vst.msk [vmem:[#allocation2 + $0x8] sm:$0xff] %vm279_vm0, %v2645_v1  ;;  %284 = vst.msk [vmem:[#allocation2 + $0x18] sm:$0xff] %vm279_vm0, %v2645_v1  ;;  %s2408_s29 = sshll.u32 %s4365_s25, 8  ;;  %v1881_v38 = vld [vmem:[%s4166_s5 + $0x18] sm:$0xff]  ;;  %v2847_v41 = vshrl.u32 %v843_v40, 7  ;;  %v2853_v43 = vld [vmem:[%s4164_s3] sm:$0xff] }
  0x11   : > { %287 = vst.msk [vmem:[#allocation2 + $0x30] sm:$0xff] %vm279_vm0, %v2645_v1  ;;  %288 = vst.msk [vmem:[#allocation2 + $0x38] sm:$0xff] %vm279_vm0, %v2645_v1  ;;  %s2769_s9 = scalar_lea.vmem %s4161_s0, %s2408_s29  ;;  %2586 = vmatprep.subr.bf16.mxu1 %v2585_v36  ;;  %v2589_v39 = vpack.c.bf16 %v1881_v38, %v1880_v37  ;;  %v2859_v45 = vld [vmem:[%s4163_s2] ss:$0 sm:$0xff]  ;;  %s4029_s17 = scalar_lea.vmem %s4168_s7, %s2408_s29 }
  0x12   : > { %289 = vst.msk [vmem:[#allocation2 + $0x40] sm:$0x3] %vm282_vm1, %v2645_v1  ;;  %292 = vst.msk [vmem:[#allocation2 + $0x58] sm:$0x3] %vm282_vm1, %v2645_v1  ;;  %v335_v2 = vld [vmem:[%s2769_s9] sm:$0xff]  ;;  %v336_v3 = vld [vmem:[%s2769_s9 + $0x8] sm:$0xff]  ;;  %2588 = vmatpush3.bf16.msra.mxu1 %v2585_v36 }
  0x13   : > { %290 = vst.msk [vmem:[#allocation2 + $0x48] sm:$0xff] %vm279_vm0, %v2645_v1  ;;  %291 = vst.msk [vmem:[#allocation2 + $0x50] sm:$0xff] %vm279_vm0, %v2645_v1  ;;  %v337_v4 = vld [vmem:[%s2769_s9 + $0x10] sm:$0xff]  ;;  %2481 = vmatprep.mubr.msk.f32.mxu0 %vm375_vm2, %v335_v2  ;;  %v338_v5 = vld [vmem:[%s2769_s9 + $0x18] sm:$0xff]  ;;  %2590 = vmatprep.subr.bf16.mxu1 %v2589_v39  ;;  %v845_v42 = vsub.s32 0, %v2847_v41  ;;  %v945_v44 = vsub.s32 1, %v2847_v41 }
  0x14   : > { %293 = vst.msk [vmem:[#allocation2 + $0x60] sm:$0xff] %vm279_vm0, %v2645_v1  ;;  %294 = vst.msk [vmem:[#allocation2 + $0x68] sm:$0xff] %vm279_vm0, %v2645_v1  ;;  %2482 = vmatmul.mubr.msk.f32.vlgmr.msra.gmra.mrb[0].mxu0 %vm375_vm2, %v336_v3  ;;  %v339_v6 = vld [vmem:[%s2769_s9 + $0x20] sm:$0xff]  ;;  %v340_v7 = vld [vmem:[%s2769_s9 + $0x28] sm:$0xff]  ;;  %v1045_v46 = vsub.s32 2, %v2847_v41 }
  0x15   : > { %295 = vst.msk [vmem:[#allocation2 + $0x70] sm:$0x3] %vm282_vm1, %v2645_v1  ;;  %298 = vst.msk [vmem:[#allocation2 + $0x88] sm:$0x3] %vm282_vm1, %v2645_v1  ;;  %2484 = vmatprep.mubr.msk.f32.mxu0 %vm375_vm2, %v337_v4  ;;  %v341_v8 = vld [vmem:[%s2769_s9 + $0x30] sm:$0xff]  ;;  %v342_v9 = vld [vmem:[%s2769_s9 + $0x38] sm:$0xff]  ;;  %v2863_v47 = vrot.slane %v2853_v43, %v845_v42  ;;  %v2866_v49 = vrot.slane %v2853_v43, %v945_v44 }
  0x16   : > { %296 = vst.msk [vmem:[#allocation2 + $0x78] sm:$0xff] %vm279_vm0, %v2645_v1  ;;  %297 = vst.msk [vmem:[#allocation2 + $0x80] sm:$0xff] %vm279_vm0, %v2645_v1  ;;  %v343_v10 = vld [vmem:[%s2769_s9 + $0x40] sm:$0xff]  ;;  %v344_v11 = vld [vmem:[%s2769_s9 + $0x48] sm:$0xff]  ;;  %2592 = vmatpush3.bf16.msra.mxu1 %v2589_v39  ;;  %v2871_v58 = vrot.slane %v2853_v43, %v1045_v46 }
  0x17   : > { %299 = vst.msk [vmem:[#allocation2 + $0x90] sm:$0xff] %vm279_vm0, %v2645_v1  ;;  %300 = vst.msk [vmem:[#allocation2 + $0x98] sm:$0xff] %vm279_vm0, %v2645_v1  ;;  %v345_v12 = vld [vmem:[%s2769_s9 + $0x50] sm:$0xff]  ;;  %v346_v13 = vld [vmem:[%s2769_s9 + $0x58] sm:$0xff] }
  0x18   : > { %301 = vst.msk [vmem:[#allocation2 + $0xa0] sm:$0x3] %vm282_vm1, %v2645_v1  ;;  %304 = vst.msk [vmem:[#allocation2 + $0xb8] sm:$0x3] %vm282_vm1, %v2645_v1  ;;  %2485 = vmatmul.mubr.msk.f32.gmra.mrb[2].mxu0 %vm375_vm2, %v338_v5  ;;  %v347_v14 = vld [vmem:[%s2769_s9 + $0x60] sm:$0xff]  ;;  %v348_v15 = vld [vmem:[%s2769_s9 + $0x68] sm:$0xff] }
  0x19   : > { %302 = vst.msk [vmem:[#allocation2 + $0xa8] sm:$0xff] %vm279_vm0, %v2645_v1  ;;  %303 = vst.msk [vmem:[#allocation2 + $0xb0] sm:$0xff] %vm279_vm0, %v2645_v1  ;;  %2487 = vmatprep.mubr.msk.f32.mxu0 %vm375_vm2, %v339_v6  ;;  %v349_v16 = vld [vmem:[%s2769_s9 + $0x70] sm:$0xff]  ;;  %v350_v17 = vld [vmem:[%s2769_s9 + $0x78] sm:$0xff] }
  0x1a   : > { %305 = vst.msk [vmem:[#allocation2 + $0xc0] sm:$0xff] %vm279_vm0, %v2645_v1  ;;  %306 = vst.msk [vmem:[#allocation2 + $0xc8] sm:$0xff] %vm279_vm0, %v2645_v1  ;;  %v351_v18 = vld [vmem:[%s2769_s9 + $0x80] sm:$0xff]  ;;  %v352_v19 = vld [vmem:[%s2769_s9 + $0x88] sm:$0xff] }
  0x1b   : > { %307 = vst.msk [vmem:[#allocation2 + $0xd0] sm:$0x3] %vm282_vm1, %v2645_v1  ;;  %310 = vst.msk [vmem:[#allocation2 + $0xe8] sm:$0x3] %vm282_vm1, %v2645_v1  ;;  %v353_v20 = vld [vmem:[%s2769_s9 + $0x90] sm:$0xff]  ;;  %v354_v21 = vld [vmem:[%s2769_s9 + $0x98] sm:$0xff] }
  0x1c   : > { %308 = vst.msk [vmem:[#allocation2 + $0xd8] sm:$0xff] %vm279_vm0, %v2645_v1  ;;  %309 = vst.msk [vmem:[#allocation2 + $0xe0] sm:$0xff] %vm279_vm0, %v2645_v1  ;;  %2488 = vmatmul.mubr.msk.f32.gmra.mrb[4].mxu0 %vm375_vm2, %v340_v7  ;;  %v355_v22 = vld [vmem:[%s2769_s9 + $0xa0] sm:$0xff]  ;;  %v356_v23 = vld [vmem:[%s2769_s9 + $0xa8] sm:$0xff] }
  0x1d   : > { %311 = vst.msk [vmem:[#allocation2 + $0xf0] sm:$0xff] %vm279_vm0, %v2645_v1  ;;  %312 = vst.msk [vmem:[#allocation2 + $0xf8] sm:$0xff] %vm279_vm0, %v2645_v1  ;;  %2490 = vmatprep.mubr.msk.f32.mxu0 %vm375_vm2, %v341_v8  ;;  %v357_v24 = vld [vmem:[%s2769_s9 + $0xb0] sm:$0xff]  ;;  %v358_v25 = vld [vmem:[%s2769_s9 + $0xb8] sm:$0xff]  ;;  %v1245_v8 = vsub.s32 4, %v2847_v41 }
  0x1e   : > { %313 = vst.msk [vmem:[#allocation2 + $0x100] sm:$0x3] %vm282_vm1, %v2645_v1  ;;  %316 = vst.msk [vmem:[#allocation2 + $0x118] sm:$0x3] %vm282_vm1, %v2645_v1  ;;  %v359_v26 = vld [vmem:[%s2769_s9 + $0xc0] sm:$0xff]  ;;  %v360_v27 = vld [vmem:[%s2769_s9 + $0xc8] sm:$0xff] }
  0x1f   : > { %314 = vst.msk [vmem:[#allocation2 + $0x108] sm:$0xff] %vm279_vm0, %v2645_v1  ;;  %315 = vst.msk [vmem:[#allocation2 + $0x110] sm:$0xff] %vm279_vm0, %v2645_v1  ;;  %v361_v28 = vld [vmem:[%s2769_s9 + $0xd0] sm:$0xff]  ;;  %v362_v29 = vld [vmem:[%s2769_s9 + $0xd8] sm:$0xff] }
  0x20   : > { %317 = vst.msk [vmem:[#allocation2 + $0x120] sm:$0xff] %vm279_vm0, %v2645_v1  ;;  %318 = vst.msk [vmem:[#allocation2 + $0x128] sm:$0xff] %vm279_vm0, %v2645_v1  ;;  %2491 = vmatmul.mubr.msk.f32.gmra.mrb[6].mxu0 %vm375_vm2, %v342_v9  ;;  %v363_v30 = vld [vmem:[%s2769_s9 + $0xe0] sm:$0xff]  ;;  %v364_v31 = vld [vmem:[%s2769_s9 + $0xe8] sm:$0xff]  ;;  %v1345_v9 = vsub.s32 5, %v2847_v41 }
  0x21   : > { %319 = vst.msk [vmem:[#allocation2 + $0x130] sm:$0x3] %vm282_vm1, %v2645_v1  ;;  %322 = vst.msk [vmem:[#allocation2 + $0x148] sm:$0x3] %vm282_vm1, %v2645_v1  ;;  %2493 = vmatprep.mubr.msk.f32.mxu0 %vm375_vm2, %v343_v10  ;;  %v365_v32 = vld [vmem:[%s2769_s9 + $0xf0] sm:$0xff]  ;;  %v366_v33 = vld [vmem:[%s2769_s9 + $0xf8] sm:$0xff] }
  0x22   : > { %320 = vst.msk [vmem:[#allocation2 + $0x138] sm:$0xff] %vm279_vm0, %v2645_v1  ;;  %321 = vst.msk [vmem:[#allocation2 + $0x140] sm:$0xff] %vm279_vm0, %v2645_v1  ;;  %v811_v50 = vld [vmem:[#allocation2] sm:$0xff]  ;;  %v812_v53 = vld [vmem:[#allocation2 + $0x8] sm:$0xff]  ;;  %v1145_v10 = vsub.s32 3, %v2847_v41 }
  0x23   : > { %323 = vst.msk [vmem:[#allocation2 + $0x150] sm:$0xff] %vm279_vm0, %v2645_v1  ;;  %324 = vst.msk [vmem:[#allocation2 + $0x158] sm:$0xff] %vm279_vm0, %v2645_v1  ;;  %v911_v54 = vld [vmem:[#allocation2 + $0x1] sm:$0xff]  ;;  %v912_v55 = vld [vmem:[#allocation2 + $0x9] sm:$0xff]  ;;  %v847_v59 = vmul.f32 %v2863_v47, %v811_v50  ;;  %v848_v61 = vmul.f32 %v2863_v47, %v812_v53 }
  0x24   : > { %325 = vst.msk [vmem:[#allocation2 + $0x160] sm:$0x3] %vm282_vm1, %v2645_v1  ;;  %328 = vst.msk [vmem:[#allocation2 + $0x178] sm:$0x3] %vm282_vm1, %v2645_v1  ;;  %2494 = vmatmul.mubr.msk.f32.gmra.mrb[8].mxu0 %vm375_vm2, %v344_v11  ;;  %v947_v62 = vmul.f32 %v2866_v49, %v911_v54  ;;  %v948_v63 = vmul.f32 %v2866_v49, %v912_v55  ;;  %v1011_v2 = vld [vmem:[#allocation2 + $0x2] sm:$0xff]  ;;  %v1012_v6 = vld [vmem:[#allocation2 + $0xa] sm:$0xff] }
  0x25   : > { %326 = vst.msk [vmem:[#allocation2 + $0x168] sm:$0xff] %vm279_vm0, %v2645_v1  ;;  %327 = vst.msk [vmem:[#allocation2 + $0x170] sm:$0xff] %vm279_vm0, %v2645_v1  ;;  %2496 = vmatprep.mubr.msk.f32.mxu0 %vm375_vm2, %v345_v12 }
  0x26   : > { %329 = vst.msk [vmem:[#allocation2 + $0x180] sm:$0xff] %vm279_vm0, %v2645_v1  ;;  %330 = vst.msk [vmem:[#allocation2 + $0x188] sm:$0xff] %vm279_vm0, %v2645_v1  ;;  %v979_v12 = vadd.f32 %v947_v62, %v847_v59 }
  0x27   : > { %331 = vst.msk [vmem:[#allocation2 + $0x190] sm:$0x3] %vm282_vm1, %v2645_v1  ;;  %334 = vst.msk [vmem:[#allocation2 + $0x1a8] sm:$0x3] %vm282_vm1, %v2645_v1 }
  0x28   : > { %332 = vst.msk [vmem:[#allocation2 + $0x198] sm:$0xff] %vm279_vm0, %v2645_v1  ;;  %333 = vst.msk [vmem:[#allocation2 + $0x1a0] sm:$0xff] %vm279_vm0, %v2645_v1  ;;  %2497 = vmatmul.mubr.msk.f32.gmra.mrb[10].mxu0 %vm375_vm2, %v346_v13  ;;  %v980_v13 = vadd.f32 %v948_v63, %v848_v61 }
  0x29   : > { %2499 = vmatprep.mubr.msk.f32.mxu0 %vm375_vm2, %v347_v14  ;;  %v1047_v14 = vmul.f32 %v2871_v58, %v1011_v2 }
  0x2c   : > { %2500 = vmatmul.mubr.msk.f32.gmra.mrb[12].mxu0 %vm375_vm2, %v348_v15 }
  0x2d   : > { %2502 = vmatprep.mubr.msk.f32.mxu0 %vm375_vm2, %v349_v16 }
  0x30   : > { %2503 = vmatmul.mubr.msk.f32.gmra.mrb[14].mxu0 %vm375_vm2, %v350_v17  ;;  %v1048_v17 = vmul.f32 %v2871_v58, %v1012_v6 }
  0x31   : > { %2505 = vmatprep.mubr.msk.f32.mxu0 %vm375_vm2, %v351_v18 }
  0x34   : > { %2506 = vmatmul.mubr.msk.f32.gmra.mrb[16].mxu0 %vm375_vm2, %v352_v19  ;;  %v1545_v19 = vsub.s32 7, %v2847_v41 }
  0x35   : > { %2508 = vmatprep.mubr.msk.f32.mxu0 %vm375_vm2, %v353_v20 }
  0x38   : > { %2509 = vmatmul.mubr.msk.f32.gmra.mrb[18].mxu0 %vm375_vm2, %v354_v21 }
  0x39   : > { %2511 = vmatprep.mubr.msk.f32.mxu0 %vm375_vm2, %v355_v22 }
  0x3c   : > { %2512 = vmatmul.mubr.msk.f32.gmra.mrb[20].mxu0 %vm375_vm2, %v356_v23  ;;  %v1445_v23 = vsub.s32 6, %v2847_v41 }
  0x3d   : > { %2514 = vmatprep.mubr.msk.f32.mxu0 %vm375_vm2, %v357_v24 }
  0x3e   : > { %v2905_v38 = vrot.slane %v2853_v43, %v1445_v23 }
  0x40   : > { %2515 = vmatmul.mubr.msk.f32.gmra.mrb[22].mxu0 %vm375_vm2, %v358_v25  ;;  %v2891_v25 = vrot.slane %v2853_v43, %v1245_v8 }
  0x41   : > { %2517 = vmatprep.mubr.msk.f32.mxu0 %vm375_vm2, %v359_v26  ;;  %v2894_v26 = vrot.slane %v2853_v43, %v1345_v9 }
  0x44   : > { %2518 = vmatmul.mubr.msk.f32.gmra.mrb[24].mxu0 %vm375_vm2, %v360_v27 }
  0x45   : > { %2520 = vmatprep.mubr.msk.f32.mxu0 %vm375_vm2, %v361_v28  ;;  %v2898_v28 = vrot.slane %v2853_v43, %v1145_v10 }
  0x48   : > { %2521 = vmatmul.mubr.msk.f32.gmra.mrb[26].mxu0 %vm375_vm2, %v362_v29 }
  0x49   : > { %2523 = vmatprep.mubr.msk.f32.mxu0 %vm375_vm2, %v363_v30 }
  0x4c   : > { %2524 = vmatmul.mubr.msk.f32.gmra.mrb[28].mxu0 %vm375_vm2, %v364_v31  ;;  %v1079_v31 = vadd.f32 %v1047_v14, %v979_v12 }
  0x4d   : > { %2526 = vmatprep.mubr.msk.f32.mxu0 %vm375_vm2, %v365_v32  ;;  %v1080_v32 = vadd.f32 %v1048_v17, %v980_v13 }
  0x50   : > { %2527 = vmatmul.mubr.msk.f32.gmra.mrb[30].mxu0 %vm375_vm2, %v366_v33  ;;  %v2902_v33 = vrot.slane %v2853_v43, %v1545_v19 }
  0xe7   : > { %v2483_v48 = vpop.f32.mrb[0].mxu0 }
  0xe8   : > { %v544_v51 = vadd.f32 %v2483_v48, %v2859_v45  ;;  %v538_v52 = vpop.f32.mrb[1].mxu0 }
  0xe9   : > { %v539_v56 = vadd.f32 %v2859_v45, %v538_v52 }
  0xea   : > { %v698_v57 = vmax.f32 %v544_v51, 0.0 }
  0xeb   : > { %v697_v60 = vmax.f32 %v539_v56, 0.0  ;;  %v2486_v0 = vpop.f32.mrb[2].mxu0 }
  0xec   : > { %v730_v1 = vmin.f32 %v698_v57, 6.0  ;;  %v554_v3 = vadd.f32 %v2486_v0, %v2859_v45  ;;  %v548_v4 = vpop.f32.mrb[3].mxu0 }
  0xed   : > { %v729_v5 = vmin.f32 %v697_v60, 6.0  ;;  %v549_v7 = vadd.f32 %v2859_v45, %v548_v4 }
  0xee   : > { %763 = vst.msk [vmem:[#allocation2 + $0x21] sm:$0xff] %vm279_vm0, %v730_v1  ;;  %v700_v11 = vmax.f32 %v554_v3, 0.0 }
  0xef   : > { %762 = vst.msk [vmem:[#allocation2 + $0x19] sm:$0xff] %vm279_vm0, %v729_v5  ;;  %v699_v15 = vmax.f32 %v549_v7, 0.0  ;;  %v2489_v16 = vpop.f32.mrb[4].mxu0 }
  0xf0   : > { %v732_v18 = vmin.f32 %v700_v11, 6.0  ;;  %v564_v20 = vadd.f32 %v2489_v16, %v2859_v45  ;;  %v558_v21 = vpop.f32.mrb[5].mxu0 }
  0xf1   : > { %v731_v22 = vmin.f32 %v699_v15, 6.0  ;;  %v559_v24 = vadd.f32 %v2859_v45, %v558_v21 }
  0xf2   : > { %766 = vst.msk [vmem:[#allocation2 + $0x39] sm:$0xff] %vm279_vm0, %v732_v18  ;;  %v702_v27 = vmax.f32 %v564_v20, 0.0 }
  0xf3   : > { %765 = vst.msk [vmem:[#allocation2 + $0x31] sm:$0xff] %vm279_vm0, %v731_v22  ;;  %v701_v29 = vmax.f32 %v559_v24, 0.0  ;;  %v2492_v30 = vpop.f32.mrb[6].mxu0 }
  0xf4   : > { %v734_v34 = vmin.f32 %v702_v27, 6.0  ;;  %v568_v35 = vpop.f32.mrb[7].mxu0  ;;  %v2908_v40 = vadd.f32 %v2492_v30, %v2859_v45 }
  0xf5   : > { %v914_v36 = vld [vmem:[#allocation2 + $0x21] sm:$0xff]  ;;  %v733_v39 = vmin.f32 %v701_v29, 6.0  ;;  %v2911_v41 = vadd.f32 %v2859_v45, %v568_v35 }
  0xf6   : > { %v1014_v37 = vld [vmem:[#allocation2 + $0x22] sm:$0xff]  ;;  %v950_v42 = vmul.f32 %v2866_v49, %v914_v36  ;;  %v1248_v46 = vmul.f32 %v2891_v25, %v914_v36  ;;  %v813_v50 = vld [vmem:[#allocation2 + $0x18] sm:$0xff]  ;;  %769 = vst.msk [vmem:[#allocation2 + $0x51] sm:$0xff] %vm279_vm0, %v734_v34  ;;  %v704_v5 = vmax.f32 %v2908_v40, 0.0 }
  0xf7   : > { %v1050_v44 = vmul.f32 %v2871_v58, %v1014_v37  ;;  %v2917_v48 = vmul.f32 %v2894_v26, %v1014_v37  ;;  %v814_v51 = vld [vmem:[#allocation2 + $0x20] sm:$0xff]  ;;  %v849_v52 = vmul.f32 %v2863_v47, %v813_v50  ;;  %v1147_v56 = vmul.f32 %v2898_v28, %v813_v50  ;;  %768 = vst.msk [vmem:[#allocation2 + $0x49] sm:$0xff] %vm279_vm0, %v733_v39  ;;  %v2925_v57 = vpop.f32.mrb[8].mxu0 }
  0xf8   : > { %v913_v43 = vld [vmem:[#allocation2 + $0x19] sm:$0xff]  ;;  %v850_v53 = vmul.f32 %v2863_v47, %v814_v51  ;;  %v1148_v60 = vmul.f32 %v2898_v28, %v814_v51  ;;  %v2933_v63 = vpop.f32.mrb[9].mxu0 }
  0xf9   : > { %v949_v54 = vmul.f32 %v2866_v49, %v913_v43  ;;  %v1013_v55 = vld [vmem:[#allocation2 + $0x1a] sm:$0xff]  ;;  %v1247_v61 = vmul.f32 %v2891_v25, %v913_v43  ;;  %v1179_v2 = vadd.f32 %v1147_v56, %v1079_v31 }
  0xfa   : > { %v1049_v59 = vmul.f32 %v2871_v58, %v1013_v55  ;;  %v2931_v62 = vmul.f32 %v2894_v26, %v1013_v55  ;;  %v982_v1 = vadd.f32 %v950_v42, %v850_v53  ;;  %v916_v3 = vld [vmem:[#allocation2 + $0x39] sm:$0xff]  ;;  %v1180_v6 = vadd.f32 %v1148_v60, %v1080_v32  ;;  %v815_v10 = vld [vmem:[#allocation2 + $0x30] sm:$0xff] }
  0xfb   : > { %v981_v0 = vadd.f32 %v949_v54, %v849_v52  ;;  %v2935_v4 = vld [vmem:[#allocation2 + $0x3a] sm:$0xff]  ;;  %v952_v7 = vmul.f32 %v2866_v49, %v916_v3  ;;  %v1250_v9 = vmul.f32 %v2891_v25, %v916_v3  ;;  %v2942_v12 = vld [vmem:[#allocation2 + $0x31] sm:$0xff]  ;;  %v2944_v14 = vadd.f32 %v1247_v61, %v1179_v2  ;;  %v2953_v18 = vpop.f32.mrb[10].mxu0 }
  0xfc   : > { %v1052_v8 = vmul.f32 %v2871_v58, %v2935_v4  ;;  %v816_v11 = vld [vmem:[#allocation2 + $0x38] sm:$0xff]  ;;  %v2948_v15 = vmul.f32 %v2894_v26, %v2935_v4  ;;  %v2951_v16 = vmul.f32 %v2902_v33, %v916_v3  ;;  %v2955_v19 = vadd.f32 %v1248_v46, %v1180_v6  ;;  %v588_v23 = vpop.f32.mrb[11].mxu0 }
  0xfd   : > { %v1081_v13 = vadd.f32 %v1049_v59, %v981_v0  ;;  %v1015_v17 = vld [vmem:[#allocation2 + $0x32] sm:$0xff]  ;;  %v851_v20 = vmul.f32 %v2863_v47, %v815_v10  ;;  %v852_v21 = vmul.f32 %v2863_v47, %v816_v11  ;;  %v951_v22 = vmul.f32 %v2866_v49, %v2942_v12 }
  0xfe   : > { %v1051_v24 = vmul.f32 %v2871_v58, %v1015_v17  ;;  %v1082_v27 = vadd.f32 %v1050_v44, %v982_v1  ;;  %v1149_v29 = vmul.f32 %v2898_v28, %v815_v10  ;;  %v1150_v30 = vmul.f32 %v2898_v28, %v816_v11  ;;  %v918_v31 = vld [vmem:[#allocation2 + $0x51] sm:$0xff]  ;;  %v817_v39 = vld [vmem:[#allocation2 + $0x48] sm:$0xff] }
  0xff   : > { %v2964_v32 = vld [vmem:[#allocation2 + $0x52] sm:$0xff]  ;;  %v983_v34 = vadd.f32 %v951_v22, %v851_v20  ;;  %v984_v35 = vadd.f32 %v952_v7, %v852_v21  ;;  %v1249_v36 = vmul.f32 %v2891_v25, %v2942_v12  ;;  %v1349_v37 = vmul.f32 %v2894_v26, %v1015_v17  ;;  %v917_v43 = vld [vmem:[#allocation2 + $0x49] sm:$0xff]  ;;  %v2501_v53 = vpop.f32.mrb[12].mxu0 }
 0x100   : > { %v1181_v42 = vadd.f32 %v1149_v29, %v1081_v13  ;;  %v1182_v46 = vadd.f32 %v1150_v30, %v1082_v27  ;;  %v2970_v50 = vmul.f32 %v2905_v38, %v815_v10  ;;  %v2973_v44 = vmul.f32 %v2905_v38, %v816_v11  ;;  %v818_v51 = vld [vmem:[#allocation2 + $0x50] sm:$0xff]  ;;  %v598_v60 = vpop.f32.mrb[13].mxu0 }
 0x101   : > { %v2975_v52 = vld [vmem:[#allocation2 + $0x4a] sm:$0xff]  ;;  %v1083_v54 = vadd.f32 %v1051_v24, %v983_v34  ;;  %v954_v55 = vmul.f32 %v2866_v49, %v918_v31  ;;  %v1054_v56 = vmul.f32 %v2871_v58, %v2964_v32  ;;  %v1252_v59 = vmul.f32 %v2891_v25, %v918_v31 }
 0x102   : > { %v1281_v61 = vadd.f32 %v1249_v36, %v1181_v42  ;;  %v2981_v0 = vadd.f32 %v1250_v9, %v1182_v46  ;;  %v2985_v1 = vmul.f32 %v2894_v26, %v2964_v32  ;;  %v2988_v2 = vmul.f32 %v2902_v33, %v918_v31 }
 0x103   : > { %v853_v3 = vmul.f32 %v2863_v47, %v817_v39  ;;  %v854_v6 = vmul.f32 %v2863_v47, %v818_v51  ;;  %v953_v7 = vmul.f32 %v2866_v49, %v917_v43  ;;  %v1053_v10 = vmul.f32 %v2871_v58, %v2975_v52  ;;  %v2504_v20 = vpop.f32.mrb[14].mxu0 }
 0x104   : > { %4189 = vst [vmem:[#allocation4_spill] sm:$0xff] %v2985_v1  ;;  %4190 = vst [vmem:[#allocation5_spill] sm:$0xff] %v2988_v2  ;;  %v2995_v11 = vadd.f32 %v1349_v37, %v1281_v61  ;;  %v1084_v9 = vadd.f32 %v1052_v8, %v984_v35  ;;  %v1151_v13 = vmul.f32 %v2898_v28, %v817_v39  ;;  %v608_v29 = vpop.f32.mrb[15].mxu0  ;;  %v736_v37 = vmin.f32 %v704_v5, 6.0 }
 0x105   : > { %v1152_v17 = vmul.f32 %v2898_v28, %v818_v51  ;;  %v985_v21 = vadd.f32 %v953_v7, %v853_v3  ;;  %v986_v22 = vadd.f32 %v954_v55, %v854_v6  ;;  %v1251_v24 = vmul.f32 %v2891_v25, %v917_v43 }
 0x106   : > { %v1351_v27 = vmul.f32 %v2894_v26, %v2975_v52  ;;  %v1183_v30 = vadd.f32 %v1151_v13, %v1083_v54  ;;  %v3003_v34 = vmul.f32 %v2905_v38, %v817_v39  ;;  %v3006_v8 = vmul.f32 %v2905_v38, %v818_v51  ;;  %772 = vst.msk [vmem:[#allocation2 + $0x69] sm:$0xff] %vm279_vm0, %v736_v37 }
 0x107   : > { %v1184_v31 = vadd.f32 %v1152_v17, %v1084_v9  ;;  %v3008_v35 = vadd.f32 %v1053_v10, %v985_v21  ;;  %v3011_v36 = vmul.f32 %v2902_v33, %v917_v43  ;;  %v703_v42 = vmax.f32 %v2911_v41, 0.0  ;;  %v2507_v51 = vpop.f32.mrb[16].mxu0 }
 0x108   : > { %v1283_v46 = vadd.f32 %v1251_v24, %v1183_v30  ;;  %v3018_v54 = vadd.f32 %v1054_v56, %v986_v22  ;;  %v584_v39 = vadd.f32 %v2925_v57, %v2859_v45  ;;  %v579_v43 = vadd.f32 %v2859_v45, %v2933_v63  ;;  %v618_v5 = vpop.f32.mrb[17].mxu0 }
 0x109   : > { %v3016_v55 = vadd.f32 %v1252_v59, %v1184_v31  ;;  %v735_v61 = vmin.f32 %v703_v42, 6.0  ;;  %v594_v40 = vadd.f32 %v2953_v18, %v2859_v45  ;;  %v589_v41 = vadd.f32 %v2859_v45, %v588_v23 }
 0x10a   : > { %v3028_v59 = vadd.f32 %v1351_v27, %v1283_v46  ;;  %v706_v56 = vmax.f32 %v584_v39, 0.0  ;;  %v604_v3 = vadd.f32 %v2501_v53, %v2859_v45  ;;  %v599_v57 = vadd.f32 %v2859_v45, %v598_v60 }
 0x10b   : > { %4191 = vst [vmem:[#allocation6_spill] sm:$0xff] %v3016_v55  ;;  %771 = vst.msk [vmem:[#allocation2 + $0x61] sm:$0xff] %vm279_vm0, %v735_v61  ;;  %v705_v6 = vmax.f32 %v579_v43, 0.0  ;;  %v708_v7 = vmax.f32 %v594_v40, 0.0  ;;  %v707_v10 = vmax.f32 %v589_v41, 0.0  ;;  %v614_v63 = vadd.f32 %v2504_v20, %v2859_v45  ;;  %v2510_v17 = vpop.f32.mrb[18].mxu0 }
 0x10c   : > { %4192 = vst [vmem:[#allocation7_spill] sm:$0xff] %v3028_v59  ;;  %v738_v9 = vmin.f32 %v706_v56, 6.0  ;;  %v710_v13 = vmax.f32 %v604_v3, 0.0  ;;  %v709_v18 = vmax.f32 %v599_v57, 0.0  ;;  %v609_v23 = vadd.f32 %v2859_v45, %v608_v29  ;;  %v628_v53 = vpop.f32.mrb[19].mxu0 }
 0x10d   : > { %v737_v21 = vmin.f32 %v705_v6, 6.0  ;;  %v740_v22 = vmin.f32 %v708_v7, 6.0  ;;  %v739_v24 = vmin.f32 %v707_v10, 6.0  ;;  %v712_v27 = vmax.f32 %v614_v63, 0.0  ;;  %v920_v39 = vld [vmem:[#allocation2 + $0x69] sm:$0xff] }
 0x10e   : > { %775 = vst.msk [vmem:[#allocation2 + $0x81] sm:$0xff] %vm279_vm0, %v738_v9  ;;  %v742_v60 = vmin.f32 %v710_v13, 6.0  ;;  %v741_v30 = vmin.f32 %v709_v18, 6.0  ;;  %v711_v31 = vmax.f32 %v609_v23, 0.0  ;;  %v624_v37 = vadd.f32 %v2507_v51, %v2859_v45  ;;  %v3049_v61 = vld [vmem:[#allocation2 + $0x6a] sm:$0xff] }
 0x10f   : > { %774 = vst.msk [vmem:[#allocation2 + $0x79] sm:$0xff] %vm279_vm0, %v737_v21  ;;  %778 = vst.msk [vmem:[#allocation2 + $0x99] sm:$0xff] %vm279_vm0, %v740_v22  ;;  %v744_v20 = vmin.f32 %v712_v27, 6.0  ;;  %v3041_v29 = vadd.f32 %v2859_v45, %v618_v5  ;;  %v3044_v42 = vadd.f32 %v2510_v17, %v2859_v45  ;;  %v3047_v46 = vadd.f32 %v2859_v45, %v628_v53  ;;  %v3053_v40 = vpop.f32.mrb[20].mxu0 }
 0x110   : > { %777 = vst.msk [vmem:[#allocation2 + $0x91] sm:$0xff] %vm279_vm0, %v739_v24  ;;  %4193 = vst [vmem:[#allocation8_spill] sm:$0xff] %v3049_v61  ;;  %v743_v51 = vmin.f32 %v711_v31, 6.0  ;;  %v714_v43 = vmax.f32 %v624_v37, 0.0  ;;  %v3057_v41 = vadd.f32 %v2931_v62, %v2944_v14  ;;  %v3061_v5 = vmul.f32 %v2902_v33, %v2942_v12  ;;  %v3072_v7 = vpop.f32.mrb[21].mxu0 }
 0x111   : > { %781 = vst.msk [vmem:[#allocation2 + $0xb1] sm:$0xff] %vm279_vm0, %v742_v60  ;;  %780 = vst.msk [vmem:[#allocation2 + $0xa9] sm:$0xff] %vm279_vm0, %v741_v30  ;;  %v956_v56 = vmul.f32 %v2866_v49, %v920_v39  ;;  %v1056_v3 = vmul.f32 %v2871_v58, %v3049_v61  ;;  %v1254_v57 = vmul.f32 %v2891_v25, %v920_v39 }
 0x112   : > { %v3069_v6 = vmul.f32 %v2894_v26, %v3049_v61  ;;  %784 = vst.msk [vmem:[#allocation2 + $0xc9] sm:$0xff] %vm279_vm0, %v744_v20  ;;  %v3075_v62 = vmul.f32 %v2902_v33, %v920_v39  ;;  %v819_v12 = vld [vmem:[#allocation2 + $0x60] sm:$0xff]  ;;  %v820_v14 = vld [vmem:[#allocation2 + $0x68] sm:$0xff]  ;;  %783 = vst.msk [vmem:[#allocation2 + $0xc1] sm:$0xff] %vm279_vm0, %v743_v51  ;;  %v746_v63 = vmin.f32 %v714_v43, 6.0 }
 0x113   : > { %v919_v10 = vld [vmem:[#allocation2 + $0x61] sm:$0xff]  ;;  %v855_v18 = vmul.f32 %v2863_v47, %v819_v12  ;;  %v856_v23 = vmul.f32 %v2863_v47, %v820_v14  ;;  %v1153_v22 = vmul.f32 %v2898_v28, %v819_v12  ;;  %v1154_v27 = vmul.f32 %v2898_v28, %v820_v14  ;;  %v3093_v30 = vpop.f32.mrb[22].mxu0 }
 0x114   : > { %4194 = vst [vmem:[#allocation9_spill] sm:$0xff] %v3069_v6  ;;  %4195 = vst [vmem:[#allocation10_spill] sm:$0xff] %v3075_v62  ;;  %v955_v17 = vmul.f32 %v2866_v49, %v919_v10  ;;  %v3083_v21 = vld [vmem:[#allocation2 + $0x62] sm:$0xff]  ;;  %v1253_v53 = vmul.f32 %v2891_v25, %v919_v10  ;;  %v3097_v39 = vmul.f32 %v2905_v38, %v819_v12  ;;  %v3101_v13 = vpop.f32.mrb[23].mxu0 }
 0x115   : > { %4196 = vst [vmem:[#allocation11_spill] sm:$0xff] %v3083_v21  ;;  %v1055_v24 = vmul.f32 %v2871_v58, %v3083_v21  ;;  %v1353_v60 = vmul.f32 %v2894_v26, %v3083_v21  ;;  %787 = vst.msk [vmem:[#allocation2 + $0xe1] sm:$0xff] %vm279_vm0, %v746_v63  ;;  %v988_v37 = vadd.f32 %v956_v56, %v856_v23  ;;  %v922_v51 = vld [vmem:[#allocation2 + $0x81] sm:$0xff] }
 0x116   : > { %v987_v31 = vadd.f32 %v955_v17, %v855_v18  ;;  %v1185_v20 = vadd.f32 %v1153_v22, %v3008_v35  ;;  %4197 = vst [vmem:[#allocation12_spill] sm:$0xff] %v3097_v39  ;;  %v3099_v43 = vld [vmem:[#allocation2 + $0x82] sm:$0xff]  ;;  %v1186_v9 = vadd.f32 %v1154_v27, %v3018_v54  ;;  %v3105_v6 = vmul.f32 %v2905_v38, %v820_v14  ;;  %v821_v18 = vld [vmem:[#allocation2 + $0x78] sm:$0xff] }
 0x117   : > { %4198 = vst [vmem:[#allocation13_spill] sm:$0xff] %v3099_v43  ;;  %v3108_v63 = vmul.f32 %v2902_v33, %v919_v10  ;;  %v958_v56 = vmul.f32 %v2866_v49, %v922_v51  ;;  %v822_v35 = vld [vmem:[#allocation2 + $0x80] sm:$0xff]  ;;  %v1058_v22 = vmul.f32 %v2871_v58, %v3099_v43  ;;  %v1256_v62 = vmul.f32 %v2891_v25, %v922_v51  ;;  %v823_v55 = vld [vmem:[#allocation2 + $0x90] sm:$0xff]  ;;  %v824_v2 = vld [vmem:[#allocation2 + $0x98] sm:$0xff] }
 0x118   : > { %4199 = vst [vmem:[#allocation14_spill] sm:$0xff] %v3105_v6  ;;  %v921_v23 = vld [vmem:[#allocation2 + $0x79] sm:$0xff]  ;;  %v1087_v12 = vadd.f32 %v1055_v24, %v987_v31  ;;  %v1285_v17 = vadd.f32 %v1253_v53, %v1185_v20  ;;  %v3116_v54 = vadd.f32 %v1254_v57, %v1186_v9  ;;  %v3120_v14 = vmul.f32 %v2894_v26, %v3099_v43  ;;  %v3126_v24 = vpop.f32.mrb[24].mxu0  ;;  %v923_v39 = vld [vmem:[#allocation2 + $0x91] sm:$0xff] }
 0x119   : > { %4200 = vst [vmem:[#allocation15_spill] sm:$0xff] %v3108_v63  ;;  %v3114_v61 = vld [vmem:[#allocation2 + $0x7a] sm:$0xff]  ;;  %v3123_v10 = vmul.f32 %v2902_v33, %v922_v51  ;;  %v857_v27 = vmul.f32 %v2863_v47, %v821_v18  ;;  %v858_v31 = vmul.f32 %v2863_v47, %v822_v35  ;;  %v957_v20 = vmul.f32 %v2866_v49, %v921_v23  ;;  %v3134_v9 = vpop.f32.mrb[25].mxu0  ;;  %v3152_v59 = vld [vmem:[#allocation2 + $0x92] sm:$0xff] }
 0x11a   : > { %4201 = vst [vmem:[#allocation16_spill] sm:$0xff] %v3114_v61  ;;  %4202 = vst [vmem:[#allocation17_spill] sm:$0xff] %v3116_v54  ;;  %v3128_v53 = vadd.f32 %v1353_v60, %v1285_v17  ;;  %v1057_v57 = vmul.f32 %v2871_v58, %v3114_v61  ;;  %v1088_v43 = vadd.f32 %v1056_v3, %v988_v37  ;;  %v924_v54 = vld [vmem:[#allocation2 + $0x99] sm:$0xff] }
 0x11b   : > { %4203 = vst [vmem:[#allocation18_spill] sm:$0xff] %v3120_v14  ;;  %4204 = vst [vmem:[#allocation19_spill] sm:$0xff] %v3123_v10  ;;  %v1155_v14 = vmul.f32 %v2898_v28, %v821_v18  ;;  %v1156_v51 = vmul.f32 %v2898_v28, %v822_v35  ;;  %v1255_v10 = vmul.f32 %v2891_v25, %v921_v23  ;;  %v3139_v6 = vld [vmem:[#allocation2 + $0x9a] sm:$0xff] }
 0x11c   : > { %4205 = vst [vmem:[#allocation20_spill] sm:$0xff] %v3128_v53  ;;  %4206 = vst [vmem:[#allocation21_spill] sm:$0xff] %v3139_v6  ;;  %v989_v60 = vadd.f32 %v957_v20, %v857_v27  ;;  %v990_v17 = vadd.f32 %v958_v56, %v858_v31  ;;  %v1355_v53 = vmul.f32 %v2894_v26, %v3114_v61  ;;  %v3154_v56 = vpop.f32.mrb[26].mxu0 }
 0x11d   : > { %v3144_v1 = vmul.f32 %v2905_v38, %v821_v18  ;;  %v1187_v63 = vadd.f32 %v1155_v14, %v1087_v12  ;;  %v1188_v3 = vadd.f32 %v1156_v51, %v1088_v43  ;;  %v3147_v37 = vmul.f32 %v2905_v38, %v822_v35  ;;  %4210 = vst [vmem:[#allocation25_spill] sm:$0xff] %v3152_v59  ;;  %v3160_v12 = vpop.f32.mrb[27].mxu0 }
 0x11e   : > { %v3150_v21 = vmul.f32 %v2902_v33, %v921_v23  ;;  %v1089_v27 = vadd.f32 %v1057_v57, %v989_v60  ;;  %v960_v31 = vmul.f32 %v2866_v49, %v924_v54  ;;  %v1060_v18 = vmul.f32 %v2871_v58, %v3139_v6  ;;  %4211 = vst [vmem:[#allocation26_spill] sm:$0xff] %v3160_v12  ;;  %v826_v12 = vld [vmem:[#allocation2 + $0xb0] sm:$0xff] }
 0x11f   : > { %4207 = vst [vmem:[#allocation22_spill] sm:$0xff] %v3144_v1  ;;  %4208 = vst [vmem:[#allocation23_spill] sm:$0xff] %v3147_v37  ;;  %v1258_v43 = vmul.f32 %v2891_v25, %v924_v54  ;;  %v1287_v35 = vadd.f32 %v1255_v10, %v1187_v63  ;;  %v3162_v14 = vadd.f32 %v1256_v62, %v1188_v3  ;;  %v926_v3 = vld [vmem:[#allocation2 + $0xb1] sm:$0xff] }
 0x120   : > { %4209 = vst [vmem:[#allocation24_spill] sm:$0xff] %v3150_v21  ;;  %v3166_v23 = vmul.f32 %v2894_v26, %v3139_v6  ;;  %v3169_v20 = vmul.f32 %v2902_v33, %v924_v54  ;;  %v859_v57 = vmul.f32 %v2863_v47, %v823_v55  ;;  %v860_v51 = vmul.f32 %v2863_v47, %v824_v2  ;;  %v3182_v54 = vpop.f32.mrb[28].mxu0 }
 0x121   : > { %4212 = vst [vmem:[#allocation27_spill] sm:$0xff] %v3162_v14  ;;  %v959_v60 = vmul.f32 %v2866_v49, %v923_v39  ;;  %v1059_v37 = vmul.f32 %v2871_v58, %v3152_v59  ;;  %v3176_v21 = vadd.f32 %v1355_v53, %v1287_v35  ;;  %v1090_v62 = vadd.f32 %v1058_v22, %v990_v17  ;;  %v3187_v1 = vpop.f32.mrb[29].mxu0 }
 0x122   : > { %4213 = vst [vmem:[#allocation28_spill] sm:$0xff] %v3166_v23  ;;  %4214 = vst [vmem:[#allocation29_spill] sm:$0xff] %v3169_v20  ;;  %v1157_v63 = vmul.f32 %v2898_v28, %v823_v55  ;;  %v1158_v10 = vmul.f32 %v2898_v28, %v824_v2  ;;  %v3180_v23 = vld [vmem:[#allocation2 + $0xb2] sm:$0xff]  ;;  %v992_v6 = vadd.f32 %v960_v31, %v860_v51 }
 0x123   : > { %4215 = vst [vmem:[#allocation30_spill] sm:$0xff] %v3176_v21  ;;  %4216 = vst [vmem:[#allocation31_spill] sm:$0xff] %v3180_v23  ;;  %v991_v20 = vadd.f32 %v959_v60, %v859_v57  ;;  %v1257_v14 = vmul.f32 %v2891_v25, %v923_v39  ;;  %v1357_v61 = vmul.f32 %v2894_v26, %v3152_v59  ;;  %v825_v21 = vld [vmem:[#allocation2 + $0xa8] sm:$0xff] }
 0x124   : > { %4217 = vst [vmem:[#allocation32_spill] sm:$0xff] %v3182_v54  ;;  %v1189_v53 = vadd.f32 %v1157_v63, %v1089_v27  ;;  %v1190_v22 = vadd.f32 %v1158_v10, %v1090_v62  ;;  %v3190_v17 = vmul.f32 %v2905_v38, %v823_v55  ;;  %v3193_v35 = vmul.f32 %v2905_v38, %v824_v2  ;;  %v925_v54 = vld [vmem:[#allocation2 + $0xa9] sm:$0xff] }
 0x125   : > { %v1091_v57 = vadd.f32 %v1059_v37, %v991_v20  ;;  %v3196_v31 = vmul.f32 %v2902_v33, %v923_v39  ;;  %v962_v51 = vmul.f32 %v2866_v49, %v926_v3  ;;  %v1062_v60 = vmul.f32 %v2871_v58, %v3180_v23  ;;  %v3201_v27 = vld [vmem:[#allocation2 + $0xaa] sm:$0xff]  ;;  %v3210_v37 = vpop.f32.mrb[30].mxu0 }
 0x126   : > { %4218 = vst [vmem:[#allocation33_spill] sm:$0xff] %v3190_v17  ;;  %4219 = vst [vmem:[#allocation34_spill] sm:$0xff] %v3193_v35  ;;  %v1289_v62 = vadd.f32 %v1257_v14, %v1189_v53  ;;  %v3203_v55 = vadd.f32 %v1258_v43, %v1190_v22  ;;  %v1260_v2 = vmul.f32 %v2891_v25, %v926_v3  ;;  %v3218_v14 = vpop.f32.mrb[31].mxu0 }
 0x127   : > { %4220 = vst [vmem:[#allocation35_spill] sm:$0xff] %v3196_v31  ;;  %4221 = vst [vmem:[#allocation36_spill] sm:$0xff] %v3201_v27  ;;  %v3208_v63 = vmul.f32 %v2894_v26, %v3180_v23  ;;  %v3213_v39 = vmul.f32 %v2902_v33, %v926_v3  ;;  %v861_v20 = vmul.f32 %v2863_v47, %v825_v21  ;;  %v928_v23 = vld [vmem:[#allocation2 + $0xc9] sm:$0xff] }
 0x128   : > { %4222 = vst [vmem:[#allocation37_spill] sm:$0xff] %v3203_v55  ;;  %v862_v10 = vmul.f32 %v2863_v47, %v826_v12  ;;  %v961_v35 = vmul.f32 %v2866_v49, %v925_v54  ;;  %4225 = vst [vmem:[#allocation40_spill] sm:$0xff] %v3218_v14  ;;  %v3220_v43 = vadd.f32 %v1357_v61, %v1289_v62  ;;  %v3227_v31 = vld [vmem:[#allocation2 + $0xca] sm:$0xff]  ;;  %v927_v14 = vld [vmem:[#allocation2 + $0xc1] sm:$0xff] }
 0x129   : > { %4223 = vst [vmem:[#allocation38_spill] sm:$0xff] %v3208_v63  ;;  %4224 = vst [vmem:[#allocation39_spill] sm:$0xff] %v3213_v39  ;;  %v1061_v53 = vmul.f32 %v2871_v58, %v3201_v27  ;;  %v1092_v22 = vadd.f32 %v1060_v18, %v992_v6  ;;  %v1159_v63 = vmul.f32 %v2898_v28, %v825_v21  ;;  %v827_v18 = vld [vmem:[#allocation2 + $0xc0] sm:$0xff] }
 0x12a   : > { %4226 = vst [vmem:[#allocation41_spill] sm:$0xff] %v3220_v43  ;;  %v993_v55 = vadd.f32 %v961_v35, %v861_v20  ;;  %v994_v3 = vadd.f32 %v962_v51, %v862_v10  ;;  %v1160_v39 = vmul.f32 %v2898_v28, %v826_v12  ;;  %v1259_v59 = vmul.f32 %v2891_v25, %v925_v54  ;;  %v828_v43 = vld [vmem:[#allocation2 + $0xc8] sm:$0xff] }
 0x12b   : > { %4227 = vst [vmem:[#allocation42_spill] sm:$0xff] %v3227_v31  ;;  %v1191_v17 = vadd.f32 %v1159_v63, %v1091_v57  ;;  %v1359_v61 = vmul.f32 %v2894_v26, %v3201_v27  ;;  %v3232_v62 = vmul.f32 %v2905_v38, %v825_v21  ;;  %v3235_v6 = vmul.f32 %v2905_v38, %v826_v12  ;;  %v3241_v57 = vld [vmem:[#allocation2 + $0xc2] sm:$0xff] }
 0x12c   : > { %v1093_v35 = vadd.f32 %v1061_v53, %v993_v55  ;;  %v1192_v51 = vadd.f32 %v1160_v39, %v1092_v22  ;;  %v3238_v20 = vmul.f32 %v2902_v33, %v925_v54  ;;  %v964_v10 = vmul.f32 %v2866_v49, %v928_v23 }
 0x12d   : > { %4228 = vst [vmem:[#allocation43_spill] sm:$0xff] %v3235_v6  ;;  %v1291_v63 = vadd.f32 %v1259_v59, %v1191_v17  ;;  %v1064_v21 = vmul.f32 %v2871_v58, %v3227_v31  ;;  %v1262_v27 = vmul.f32 %v2891_v25, %v928_v23  ;;  %v3248_v12 = vmul.f32 %v2894_v26, %v3227_v31 }
 0x12e   : > { %4229 = vst [vmem:[#allocation44_spill] sm:$0xff] %v3238_v20  ;;  %v3250_v55 = vadd.f32 %v1260_v2, %v1192_v51  ;;  %v3253_v54 = vmul.f32 %v2902_v33, %v928_v23  ;;  %v863_v39 = vmul.f32 %v2863_v47, %v827_v18  ;;  %v864_v53 = vmul.f32 %v2863_v47, %v828_v43  ;;  %v930_v20 = vld [vmem:[#allocation2 + $0xe1] sm:$0xff] }
 0x12f   : > { %4230 = vst [vmem:[#allocation45_spill] sm:$0xff] %v3248_v12  ;;  %v3257_v22 = vadd.f32 %v1359_v61, %v1291_v63  ;;  %v963_v59 = vmul.f32 %v2866_v49, %v927_v14  ;;  %v1063_v17 = vmul.f32 %v2871_v58, %v3241_v57  ;;  %v1094_v6 = vadd.f32 %v1062_v60, %v994_v3  ;;  %v3265_v12 = vld [vmem:[#allocation2 + $0xe2] sm:$0xff] }
 0x130   : > { %4231 = vst [vmem:[#allocation46_spill] sm:$0xff] %v3250_v55  ;;  %4232 = vst [vmem:[#allocation47_spill] sm:$0xff] %v3253_v54  ;;  %v996_v31 = vadd.f32 %v964_v10, %v864_v53  ;;  %v1161_v2 = vmul.f32 %v2898_v28, %v827_v18  ;;  %v1162_v51 = vmul.f32 %v2898_v28, %v828_v43 }
 0x131   : > { %4233 = vst [vmem:[#allocation48_spill] sm:$0xff] %v3257_v22  ;;  %v1261_v23 = vmul.f32 %v2891_v25, %v927_v14  ;;  %4234 = vst [vmem:[#allocation49_spill] sm:$0xff] %v3265_v12  ;;  %v995_v54 = vadd.f32 %v963_v59, %v863_v39  ;;  %v1361_v61 = vmul.f32 %v2894_v26, %v3241_v57 }
 0x132   : > { %v3270_v63 = vmul.f32 %v2905_v38, %v827_v18  ;;  %v3273_v55 = vmul.f32 %v2905_v38, %v828_v43  ;;  %v1193_v60 = vadd.f32 %v1161_v2, %v1093_v35  ;;  %v1194_v3 = vadd.f32 %v1162_v51, %v1094_v6  ;;  %v1611_v2 = vld [vmem:[#allocation2 + $0x32] sm:$0xff] }
 0x133   : > { %v3276_v10 = vmul.f32 %v2902_v33, %v927_v14  ;;  %v3279_v53 = vmul.f32 %v2866_v49, %v930_v20  ;;  %v3281_v22 = vadd.f32 %v1063_v17, %v995_v54  ;;  %v3285_v39 = vmul.f32 %v2871_v58, %v3265_v12  ;;  %v3304_v17 = vld [vmem:[%s4164_s3 + $0x8] ss:$0 sm:$0xff] }
 0x134   : > { %v3288_v18 = vmul.f32 %v2891_v25, %v930_v20  ;;  %v3292_v43 = vmul.f32 %v2894_v26, %v3265_v12  ;;  %v1293_v6 = vadd.f32 %v1261_v23, %v1193_v60  ;;  %v3294_v35 = vadd.f32 %v1262_v27, %v1194_v3 }
 0x135   : > { %v3297_v14 = vmul.f32 %v2902_v33, %v930_v20  ;;  %v4237_v54 = vmax.f32 %v3041_v29, 0.0  ;;  %v3306_v51 = vadd.f32 %v1064_v21, %v996_v31  ;;  %v4238_v12 = vmax.f32 %v3044_v42, 0.0 }
 0x136   : > { %4235 = vst [vmem:[#allocation50_spill] sm:$0xff] %v3292_v43  ;;  %v715_v27 = vmax.f32 %v3047_v46, 0.0  ;;  %v644_v20 = vadd.f32 %v3053_v40, %v2859_v45  ;;  %v3313_v23 = vadd.f32 %v1361_v61, %v1293_v6  ;;  %v639_v29 = vadd.f32 %v2859_v45, %v3072_v7 }
 0x137   : > { %4236 = vst [vmem:[#allocation51_spill] sm:$0xff] %v3297_v14  ;;  %v745_v59 = vmin.f32 %v4237_v54, 6.0  ;;  %v748_v43 = vmin.f32 %v4238_v12, 6.0  ;;  %v654_v60 = vadd.f32 %v3093_v30, %v2859_v45  ;;  %v1479_v31 = vadd.f32 %v2970_v50, %v3057_v41  ;;  %v3333_v50 = vld [vmem:[%s4165_s4] ss:$0 sm:$0xff] }
 0x138   : > { %v747_v42 = vmin.f32 %v715_v27, 6.0  ;;  %v718_v46 = vmax.f32 %v644_v20, 0.0  ;;  %v1647_v21 = vmul.f32 %v3304_v17, %v1611_v2  ;;  %v649_v40 = vadd.f32 %v2859_v45, %v3101_v13 }
 0x139   : > { %786 = vst.msk [vmem:[#allocation2 + $0xd9] sm:$0xff] %vm279_vm0, %v745_v59  ;;  %790 = vst.msk [vmem:[#allocation2 + $0xf9] sm:$0xff] %vm279_vm0, %v748_v43  ;;  %v717_v12 = vmax.f32 %v639_v29, 0.0  ;;  %v720_v61 = vmax.f32 %v654_v60, 0.0  ;;  %v1579_v3 = vadd.f32 %v3061_v5, %v1479_v31  ;;  %v1380_v7 = vadd.f32 %v2917_v48, %v2955_v19 }
 0x13a   : > { %789 = vst.msk [vmem:[#allocation2 + $0xf1] sm:$0xff] %vm279_vm0, %v747_v42  ;;  %v750_v30 = vmin.f32 %v718_v46, 6.0  ;;  %v719_v41 = vmax.f32 %v649_v40, 0.0  ;;  %v3337_v43 = vmul.f32 %v3304_v17, %v2935_v4  ;;  %v664_v13 = vadd.f32 %v3126_v24, %v2859_v45 }
 0x13b   : > { %v749_v5 = vmin.f32 %v717_v12, 6.0  ;;  %v752_v6 = vmin.f32 %v720_v61, 6.0  ;;  %v1679_v54 = vadd.f32 %v1647_v21, %v1579_v3  ;;  %v1480_v48 = vadd.f32 %v2973_v44, %v1380_v7 }
 0x13c   : > { %793 = vst.msk [vmem:[#allocation2 + $0x111] sm:$0xff] %vm279_vm0, %v750_v30  ;;  %v751_v19 = vmin.f32 %v719_v41, 6.0  ;;  %v722_v59 = vmax.f32 %v664_v13, 0.0  ;;  %v1481_v2 = vadd.f32 %v3003_v34, %v2995_v11  ;;  %v3347_v27 = vmul.f32 %v3304_v17, %v2975_v52 }
 0x13d   : > { %792 = vst.msk [vmem:[#allocation2 + $0x109] sm:$0xff] %vm279_vm0, %v749_v5  ;;  %796 = vst.msk [vmem:[#allocation2 + $0x129] sm:$0xff] %vm279_vm0, %v752_v6  ;;  %v3352_v4 = vadd.f32 %v3333_v50, %v1679_v54  ;;  %v3355_v44 = vadd.f32 %v2951_v16, %v1480_v48  ;;  %v3359_v24 = vadd.f32 %v2859_v45, %v3134_v9 }
 0x13e   : > { %v3363_v11 = vadd.f32 %v2948_v15, %v2981_v0  ;;  %795 = vst.msk [vmem:[#allocation2 + $0x121] sm:$0xff] %vm279_vm0, %v751_v19  ;;  %v754_v29 = vmin.f32 %v722_v59, 6.0  ;;  %v3367_v60 = vadd.f32 %v3011_v36, %v1481_v2  ;;  %v3371_v16 = vmul.f32 %v3304_v17, %v2964_v32 }
 0x13f   : > { %v3375_v9 = vadd.f32 %v3154_v56, %v2859_v45 }
 0x140   : > { %v829_v52 = vld [vmem:[#allocation2 + $0xd8] sm:$0xff]  ;;  %v830_v34 = vld [vmem:[#allocation2 + $0xe0] sm:$0xff]  ;;  %799 = vst.msk [vmem:[#allocation2 + $0x141] sm:$0xff] %vm279_vm0, %v754_v29 }
 0x141   : > { %v929_v20 = vld [vmem:[#allocation2 + $0xd9] sm:$0xff]  ;;  %v865_v15 = vmul.f32 %v2863_v47, %v829_v52  ;;  %v866_v0 = vmul.f32 %v2863_v47, %v830_v34  ;;  %v1163_v46 = vmul.f32 %v2898_v28, %v829_v52  ;;  %v1164_v32 = vmul.f32 %v2898_v28, %v830_v34  ;;  %v831_v30 = vld [vmem:[#allocation2 + $0xf0] sm:$0xff] }
 0x142   : > { %v965_v31 = vmul.f32 %v2866_v49, %v929_v20  ;;  %v3380_v42 = vld [vmem:[#allocation2 + $0xda] sm:$0xff]  ;;  %v1263_v40 = vmul.f32 %v2891_v25, %v929_v20  ;;  %v3395_v7 = vmul.f32 %v2905_v38, %v829_v52  ;;  %v3399_v13 = vmul.f32 %v2905_v38, %v830_v34  ;;  %v931_v48 = vld [vmem:[#allocation2 + $0xf1] sm:$0xff] }
 0x143   : > { %v932_v36 = vld [vmem:[#allocation2 + $0xf9] sm:$0xff]  ;;  %v1065_v21 = vmul.f32 %v2871_v58, %v3380_v42  ;;  %v1363_v45 = vmul.f32 %v2894_v26, %v3380_v42  ;;  %v998_v61 = vadd.f32 %v3279_v53, %v866_v0  ;;  %v1195_v3 = vadd.f32 %v1163_v46, %v3281_v22 }
 0x144   : > { %v3389_v56 = vld [vmem:[#allocation2 + $0xfa] sm:$0xff]  ;;  %v997_v12 = vadd.f32 %v965_v31, %v865_v15  ;;  %v1196_v41 = vadd.f32 %v1164_v32, %v3306_v51  ;;  %v3402_v5 = vmul.f32 %v2902_v33, %v929_v20  ;;  %v968_v6 = vmul.f32 %v2866_v49, %v932_v36  ;;  %v3405_v19 = vld [vmem:[#allocation2 + $0xf2] sm:$0xff]  ;;  %v933_v14 = vld [vmem:[#allocation2 + $0x109] sm:$0xff] }
 0x145   : > { %4239 = vst [vmem:[#allocation52_spill] sm:$0xff] %v3389_v56  ;;  %v832_v54 = vld [vmem:[#allocation2 + $0xf8] sm:$0xff]  ;;  %4240 = vst [vmem:[#allocation53_spill] sm:$0xff] %v3405_v19  ;;  %v1295_v22 = vadd.f32 %v1263_v40, %v1195_v3  ;;  %v1068_v59 = vmul.f32 %v2871_v58, %v3389_v56  ;;  %v1266_v2 = vmul.f32 %v2891_v25, %v932_v36 }
 0x146   : > { %v1097_v53 = vadd.f32 %v1065_v21, %v997_v12  ;;  %v3411_v51 = vadd.f32 %v3288_v18, %v1196_v41  ;;  %v3415_v52 = vmul.f32 %v2894_v26, %v3389_v56  ;;  %v3418_v34 = vmul.f32 %v2902_v33, %v932_v36  ;;  %v934_v32 = vld [vmem:[#allocation2 + $0x111] sm:$0xff] }
 0x147   : > { %v867_v20 = vmul.f32 %v2863_v47, %v831_v30  ;;  %v3421_v29 = vadd.f32 %v1363_v45, %v1295_v22  ;;  %v868_v15 = vmul.f32 %v2863_v47, %v832_v54  ;;  %v967_v0 = vmul.f32 %v2866_v49, %v931_v48  ;;  %v3431_v40 = vld [vmem:[#allocation2 + $0x112] sm:$0xff]  ;;  %v833_v22 = vld [vmem:[#allocation2 + $0x108] sm:$0xff] }
 0x148   : > { %4241 = vst [vmem:[#allocation54_spill] sm:$0xff] %v3411_v51  ;;  %4242 = vst [vmem:[#allocation55_spill] sm:$0xff] %v3415_v52  ;;  %v1067_v31 = vmul.f32 %v2871_v58, %v3405_v19  ;;  %v1098_v18 = vadd.f32 %v3285_v39, %v998_v61  ;;  %v1165_v46 = vmul.f32 %v2898_v28, %v831_v30  ;;  %v834_v56 = vld [vmem:[#allocation2 + $0x110] sm:$0xff] }
 0x149   : > { %4243 = vst [vmem:[#allocation56_spill] sm:$0xff] %v3418_v34  ;;  %v1166_v21 = vmul.f32 %v2898_v28, %v832_v54  ;;  %v1265_v36 = vmul.f32 %v2891_v25, %v931_v48  ;;  %4244 = vst [vmem:[#allocation57_spill] sm:$0xff] %v3431_v40  ;;  %v999_v45 = vadd.f32 %v967_v0, %v867_v20  ;;  %v3444_v51 = vld [vmem:[#allocation2 + $0x10a] sm:$0xff] }
 0x14a   : > { %v1000_v12 = vadd.f32 %v968_v6, %v868_v15  ;;  %v1365_v3 = vmul.f32 %v2894_v26, %v3405_v19  ;;  %v3436_v41 = vmul.f32 %v2905_v38, %v831_v30  ;;  %v1197_v52 = vadd.f32 %v1165_v46, %v1097_v53 }
 0x14b   : > { %v1198_v39 = vadd.f32 %v1166_v21, %v1098_v18  ;;  %v3439_v61 = vmul.f32 %v2905_v38, %v832_v54  ;;  %v3442_v34 = vmul.f32 %v2902_v33, %v931_v48  ;;  %v1099_v6 = vadd.f32 %v1067_v31, %v999_v45 }
 0x14c   : > { %v970_v20 = vmul.f32 %v2866_v49, %v934_v32  ;;  %v1070_v30 = vmul.f32 %v2871_v58, %v3431_v40  ;;  %v1268_v15 = vmul.f32 %v2891_v25, %v934_v32  ;;  %v1297_v53 = vadd.f32 %v1265_v36, %v1197_v52 }
 0x14d   : > { %4245 = vst [vmem:[#allocation58_spill] sm:$0xff] %v3439_v61  ;;  %4246 = vst [vmem:[#allocation59_spill] sm:$0xff] %v3442_v34  ;;  %v3450_v0 = vadd.f32 %v1266_v2, %v1198_v39  ;;  %v3454_v54 = vmul.f32 %v2894_v26, %v3431_v40  ;;  %v3457_v48 = vmul.f32 %v2902_v33, %v934_v32  ;;  %v936_v39 = vld [vmem:[#allocation2 + $0x129] sm:$0xff] }
 0x14e   : > { %v869_v18 = vmul.f32 %v2863_v47, %v833_v22  ;;  %v870_v31 = vmul.f32 %v2863_v47, %v834_v56  ;;  %v969_v46 = vmul.f32 %v2866_v49, %v933_v14  ;;  %v1069_v21 = vmul.f32 %v2871_v58, %v3444_v51 }
 0x14f   : > { %4247 = vst [vmem:[#allocation60_spill] sm:$0xff] %v3450_v0  ;;  %4248 = vst [vmem:[#allocation61_spill] sm:$0xff] %v3454_v54  ;;  %v3464_v45 = vadd.f32 %v1365_v3, %v1297_v53  ;;  %v1100_v2 = vadd.f32 %v1068_v59, %v1000_v12  ;;  %v1167_v52 = vmul.f32 %v2898_v28, %v833_v22  ;;  %v3468_v54 = vld [vmem:[#allocation2 + $0x12a] sm:$0xff]  ;;  %v835_v12 = vld [vmem:[#allocation2 + $0x120] sm:$0xff] }
 0x150   : > { %4249 = vst [vmem:[#allocation62_spill] sm:$0xff] %v3457_v48  ;;  %v1168_v36 = vmul.f32 %v2898_v28, %v834_v56  ;;  %4251 = vst [vmem:[#allocation64_spill] sm:$0xff] %v3468_v54  ;;  %v1001_v32 = vadd.f32 %v969_v46, %v869_v18  ;;  %v1002_v48 = vadd.f32 %v970_v20, %v870_v31  ;;  %v836_v53 = vld [vmem:[#allocation2 + $0x128] sm:$0xff] }
 0x151   : > { %4250 = vst [vmem:[#allocation63_spill] sm:$0xff] %v3464_v45  ;;  %v1267_v40 = vmul.f32 %v2891_v25, %v933_v14  ;;  %v1367_v0 = vmul.f32 %v2894_v26, %v3444_v51  ;;  %v1199_v61 = vadd.f32 %v1167_v52, %v1099_v6  ;;  %v3474_v3 = vmul.f32 %v2905_v38, %v833_v22  ;;  %v935_v31 = vld [vmem:[#allocation2 + $0x121] sm:$0xff] }
 0x152   : > { %v1200_v34 = vadd.f32 %v1168_v36, %v1100_v2  ;;  %v3477_v59 = vmul.f32 %v2905_v38, %v834_v56  ;;  %v1101_v45 = vadd.f32 %v1069_v21, %v1001_v32  ;;  %v3480_v19 = vmul.f32 %v2902_v33, %v933_v14  ;;  %v3485_v6 = vld [vmem:[#allocation2 + $0x122] sm:$0xff] }
 0x153   : > { %v972_v20 = vmul.f32 %v2866_v49, %v936_v39  ;;  %v1072_v18 = vmul.f32 %v2871_v58, %v3468_v54  ;;  %4253 = vst [vmem:[#allocation66_spill] sm:$0xff] %v3485_v6  ;;  %v1299_v46 = vadd.f32 %v1267_v40, %v1199_v61  ;;  %v1270_v56 = vmul.f32 %v2891_v25, %v936_v39 }
 0x154   : > { %4252 = vst [vmem:[#allocation65_spill] sm:$0xff] %v3477_v59  ;;  %v3487_v22 = vadd.f32 %v1268_v15, %v1200_v34  ;;  %v3492_v2 = vmul.f32 %v2894_v26, %v3468_v54  ;;  %v3495_v14 = vmul.f32 %v2902_v33, %v936_v39  ;;  %v1750_v21 = vmax.f32 %v3352_v4, 0.0  ;;  %v3507_v4 = vld [vmem:[#allocation2 + $0x142] sm:$0xff] }
 0x155   : > { %v871_v52 = vmul.f32 %v2863_v47, %v835_v12  ;;  %v872_v36 = vmul.f32 %v2863_v47, %v836_v53  ;;  %v3500_v32 = vadd.f32 %v1367_v0, %v1299_v46  ;;  %v971_v34 = vmul.f32 %v2866_v49, %v935_v31  ;;  %4257 = vst [vmem:[#allocation70_spill] sm:$0xff] %v3507_v4 }
 0x156   : > { %4254 = vst [vmem:[#allocation67_spill] sm:$0xff] %v3487_v22  ;;  %4255 = vst [vmem:[#allocation68_spill] sm:$0xff] %v3492_v2  ;;  %v1071_v40 = vmul.f32 %v2871_v58, %v3485_v6  ;;  %v1102_v61 = vadd.f32 %v1070_v30, %v1002_v48  ;;  %v1782_v15 = vmin.f32 %v1750_v21, 6.0  ;;  %v1169_v2 = vmul.f32 %v2898_v28, %v835_v12 }
 0x157   : > { %4256 = vst [vmem:[#allocation69_spill] sm:$0xff] %v3495_v14  ;;  %v1004_v54 = vadd.f32 %v972_v20, %v872_v36  ;;  %v1170_v39 = vmul.f32 %v2898_v28, %v836_v53  ;;  %v938_v14 = vld [vmem:[#allocation2 + $0x141] sm:$0xff]  ;;  %v1003_v22 = vadd.f32 %v971_v34, %v871_v52  ;;  %v1269_v59 = vmul.f32 %v2891_v25, %v935_v31 }
 0x158   : > { %v1369_v0 = vmul.f32 %v2894_v26, %v3485_v6  ;;  %v3513_v46 = vmul.f32 %v2905_v38, %v835_v12  ;;  %1814 = vst.msk [vmem:[#allocation3] sm:$0xff] %vm279_vm0, %v1782_v15  ;;  %v1201_v30 = vadd.f32 %v1169_v2, %v1101_v45  ;;  %v3517_v20 = vmul.f32 %v2905_v38, %v836_v53 }
 0x159   : > { %v1202_v48 = vadd.f32 %v1170_v39, %v1102_v61  ;;  %v3520_v21 = vmul.f32 %v2902_v33, %v935_v31  ;;  %v3522_v36 = vadd.f32 %v1071_v40, %v1003_v22  ;;  %v1680_v52 = vadd.f32 %v3337_v43, %v3355_v44 }
 0x15a   : > { %4258 = vst [vmem:[#allocation71_spill] sm:$0xff] %v3513_v46  ;;  %4259 = vst [vmem:[#allocation72_spill] sm:$0xff] %v3517_v20  ;;  %v3527_v34 = vmul.f32 %v2866_v49, %v938_v14  ;;  %v3531_v12 = vmul.f32 %v2871_v58, %v3507_v4  ;;  %v1301_v45 = vadd.f32 %v1269_v59, %v1201_v30  ;;  %v721_v40 = vmax.f32 %v3359_v24, 0.0  ;;  %v4268_v24 = vld [vmem:[#allocation11_spill] sm:$0xff] }
 0x15b   : > { %4260 = vst [vmem:[#allocation73_spill] sm:$0xff] %v3520_v21  ;;  %v3533_v2 = vadd.f32 %v1270_v56, %v1202_v48  ;;  %v3536_v53 = vmul.f32 %v2891_v25, %v938_v14  ;;  %v3540_v31 = vmul.f32 %v2894_v26, %v3507_v4  ;;  %v1719_v22 = vadd.f32 %v3333_v50, %v1680_v52  ;;  %v4266_v52 = vld [vmem:[#allocation12_spill] sm:$0xff] }
 0x15c   : > { %v3544_v43 = vmul.f32 %v2902_v33, %v938_v14  ;;  %v1681_v44 = vadd.f32 %v3347_v27, %v3367_v60  ;;  %v3549_v59 = vadd.f32 %v1369_v0, %v1301_v45  ;;  %v3551_v56 = vadd.f32 %v1072_v18, %v1004_v54  ;;  %v4265_v14 = vld [vmem:[#allocation7_spill] sm:$0xff]  ;;  %v3565_v54 = vld [vmem:[%s4163_s2] ss:$0 sm:$0xff] }
 0x15d   : > { %4261 = vst [vmem:[#allocation74_spill] sm:$0xff] %v3533_v2  ;;  %4262 = vst [vmem:[#allocation75_spill] sm:$0xff] %v3540_v31  ;;  %v1482_v61 = vadd.f32 %v3006_v8, %v3363_v11  ;;  %v724_v15 = vmax.f32 %v3375_v9, 0.0  ;;  %v1751_v39 = vmax.f32 %v1719_v22, 0.0  ;;  %v753_v48 = vmin.f32 %v721_v40, 6.0  ;;  %v4267_v31 = vld [vmem:[#allocation5_spill] sm:$0xff] }
 0x15e   : > { %4263 = vst [vmem:[#allocation76_spill] sm:$0xff] %v3544_v43  ;;  %4264 = vst [vmem:[#allocation77_spill] sm:$0xff] %v3549_v59  ;;  %v1720_v30 = vadd.f32 %v3333_v50, %v1681_v44  ;;  %v1483_v43 = vadd.f32 %v4266_v52, %v4265_v14  ;;  %v1651_v0 = vmul.f32 %v3304_v17, %v4268_v24  ;;  %v4269_v8 = vld [vmem:[#allocation26_spill] sm:$0xff]  ;;  %v4270_v22 = vld [vmem:[#allocation15_spill] sm:$0xff] }
 0x15f   : > { %v1582_v27 = vadd.f32 %v4267_v31, %v1482_v61  ;;  %v756_v60 = vmin.f32 %v724_v15, 6.0  ;;  %v669_v11 = vadd.f32 %v3565_v54, %v4269_v8  ;;  %v1846_v9 = vld [vmem:[#allocation3] sm:$0xff]  ;;  %v1783_v18 = vmin.f32 %v1751_v39, 6.0  ;;  %798 = vst.msk [vmem:[#allocation2 + $0x139] sm:$0xff] %vm279_vm0, %v753_v48  ;;  %v4271_v31 = vld [vmem:[#allocation6_spill] sm:$0xff] }
 0x160   : > { %v1752_v45 = vmax.f32 %v1720_v30, 0.0  ;;  %v1583_v44 = vadd.f32 %v4270_v22, %v1483_v43  ;;  %v4272_v40 = vld [vmem:[#allocation4_spill] sm:$0xff]  ;;  %2537 = vmatprep.mubr.msk.f32.mxu1 %vm279_vm0, %v1846_v9  ;;  %v4275_v48 = vld [vmem:[#allocation14_spill] sm:$0xff] }
 0x161   : > { %v1384_v61 = vadd.f32 %v4272_v40, %v4271_v31  ;;  %v1682_v15 = vadd.f32 %v3371_v16, %v1582_v27  ;;  %802 = vst.msk [vmem:[#allocation2 + $0x159] sm:$0xff] %vm279_vm0, %v756_v60  ;;  %v723_v14 = vmax.f32 %v669_v11, 0.0  ;;  %v4273_v52 = vld [vmem:[#allocation8_spill] sm:$0xff]  ;;  %1815 = vst.msk [vmem:[#allocation3 + $0x8] sm:$0xff] %vm279_vm0, %v1783_v18  ;;  %v4277_v40 = vld [vmem:[#allocation22_spill] sm:$0xff] }
 0x162   : > { %v1652_v24 = vmul.f32 %v3304_v17, %v4273_v52  ;;  %v4274_v8 = vld [vmem:[#allocation32_spill] sm:$0xff]  ;;  %v1784_v30 = vmin.f32 %v1752_v45, 6.0  ;;  %v1683_v43 = vadd.f32 %v1651_v0, %v1583_v44  ;;  %v3593_v44 = vadd.f32 %v3565_v54, %v3187_v1 }
 0x163   : > { %v684_v39 = vadd.f32 %v3565_v54, %v4274_v8  ;;  %v1484_v22 = vadd.f32 %v4275_v48, %v1384_v61  ;;  %v4276_v31 = vld [vmem:[#allocation20_spill] sm:$0xff]  ;;  %v1721_v16 = vadd.f32 %v3333_v50, %v1682_v15  ;;  %v755_v27 = vmin.f32 %v723_v14, 6.0  ;;  %v4279_v8 = vld [vmem:[#allocation10_spill] sm:$0xff]  ;;  %v4281_v14 = vld [vmem:[#allocation17_spill] sm:$0xff] }
 0x164   : > { %v1485_v9 = vadd.f32 %v4277_v40, %v4276_v31  ;;  %v4278_v11 = vld [vmem:[#allocation16_spill] sm:$0xff]  ;;  %1816 = vst.msk [vmem:[#allocation3 + $0x10] sm:$0xff] %vm279_vm0, %v1784_v30  ;;  %v1722_v52 = vadd.f32 %v3333_v50, %v1683_v43  ;;  %v4283_v31 = vld [vmem:[#allocation13_spill] sm:$0xff] }
 0x165   : > { %v726_v60 = vmax.f32 %v684_v39, 0.0  ;;  %v1653_v4 = vmul.f32 %v3304_v17, %v4278_v11  ;;  %v1584_v18 = vadd.f32 %v4279_v8, %v1484_v22  ;;  %v4280_v45 = vld [vmem:[#allocation24_spill] sm:$0xff]  ;;  %v1753_v61 = vmax.f32 %v1721_v16, 0.0  ;;  %801 = vst.msk [vmem:[#allocation2 + $0x151] sm:$0xff] %vm279_vm0, %v755_v27  ;;  %v4282_v39 = vld [vmem:[#allocation9_spill] sm:$0xff]  ;;  %v4284_v27 = vld [vmem:[#allocation23_spill] sm:$0xff] }
 0x166   : > { %v1585_v0 = vadd.f32 %v4280_v45, %v1485_v9  ;;  %v1386_v48 = vadd.f32 %v4282_v39, %v4281_v14  ;;  %v3600_v30 = vmul.f32 %v3304_v17, %v4283_v31  ;;  %v1754_v43 = vmax.f32 %v1722_v52, 0.0  ;;  %v837_v1 = vld [vmem:[#allocation2 + $0x138] sm:$0xff]  ;;  %v838_v11 = vld [vmem:[#allocation2 + $0x140] sm:$0xff] }
 0x167   : > { %v758_v15 = vmin.f32 %v726_v60, 6.0  ;;  %v3602_v40 = vadd.f32 %v1652_v24, %v1584_v18  ;;  %v937_v16 = vld [vmem:[#allocation2 + $0x139] sm:$0xff]  ;;  %v1785_v8 = vmin.f32 %v1753_v61, 6.0  ;;  %v3613_v45 = vadd.f32 %v3565_v54, %v3210_v37 }
 0x168   : > { %v3604_v22 = vadd.f32 %v1653_v4, %v1585_v0  ;;  %v3609_v60 = vadd.f32 %v4284_v27, %v1386_v48  ;;  %v4285_v52 = vld [vmem:[#allocation30_spill] sm:$0xff]  ;;  %v4286_v24 = vld [vmem:[#allocation33_spill] sm:$0xff]  ;;  %v873_v4 = vmul.f32 %v2863_v47, %v837_v1  ;;  %v874_v0 = vmul.f32 %v2863_v47, %v838_v11 }
 0x169   : > { %805 = vst.msk [vmem:[#allocation2 + $0x171] sm:$0xff] %vm279_vm0, %v758_v15  ;;  %v3617_v18 = vadd.f32 %v4286_v24, %v4285_v52  ;;  %v973_v14 = vmul.f32 %v2866_v49, %v937_v16  ;;  %v3622_v61 = vld [vmem:[#allocation2 + $0x13a] sm:$0xff]  ;;  %v1171_v15 = vmul.f32 %v2898_v28, %v837_v1  ;;  %v1172_v31 = vmul.f32 %v2898_v28, %v838_v11 }
 0x16a   : > { %4287 = vst [vmem:[#allocation7_spill] sm:$0xff] %v3622_v61  ;;  %v940_v39 = vld [vmem:[#allocation2 + $0x159] sm:$0xff]  ;;  %v1073_v37 = vmul.f32 %v2871_v58, %v3622_v61  ;;  %v1271_v27 = vmul.f32 %v2891_v25, %v937_v16  ;;  %v1371_v52 = vmul.f32 %v2894_v26, %v3622_v61  ;;  %1817 = vst.msk [vmem:[#allocation3 + $0x18] sm:$0xff] %vm279_vm0, %v1785_v8 }
 0x16b   : > { %v1847_v48 = vld [vmem:[#allocation3 + $0x8] sm:$0xff]  ;;  %v1005_v9 = vadd.f32 %v973_v14, %v873_v4  ;;  %v1006_v2 = vadd.f32 %v3527_v34, %v874_v0  ;;  %v1203_v59 = vadd.f32 %v1171_v15, %v3522_v36  ;;  %v3638_v20 = vmul.f32 %v2905_v38, %v837_v1  ;;  %v1848_v21 = vld [vmem:[#allocation3 + $0x10] sm:$0xff] }
 0x16c   : > { %v3632_v24 = vld [vmem:[#allocation2 + $0x15a] sm:$0xff]  ;;  %2538 = vmatmul.mubr.msk.f32.vlgmr.msra.gmra.mrb[0].mxu1 %vm279_vm0, %v1847_v48  ;;  %v1204_v6 = vadd.f32 %v1172_v31, %v3551_v56  ;;  %v3642_v46 = vmul.f32 %v2905_v38, %v838_v11  ;;  %v3645_v8 = vmul.f32 %v2902_v33, %v937_v16  ;;  %v976_v61 = vmul.f32 %v2866_v49, %v940_v39  ;;  %v839_v0 = vld [vmem:[#allocation2 + $0x150] sm:$0xff] }
 0x16d   : > { %4288 = vst [vmem:[#allocation12_spill] sm:$0xff] %v3632_v24  ;;  %2540 = vmatprep.mubr.msk.f32.mxu1 %vm279_vm0, %v1848_v21  ;;  %v1105_v4 = vadd.f32 %v1073_v37, %v1005_v9  ;;  %v1303_v34 = vadd.f32 %v1271_v27, %v1203_v59  ;;  %v1076_v36 = vmul.f32 %v2871_v58, %v3632_v24  ;;  %v840_v14 = vld [vmem:[#allocation2 + $0x158] sm:$0xff]  ;;  %v1786_v21 = vmin.f32 %v1754_v43, 6.0 }
 0x16e   : > { %4289 = vst [vmem:[#allocation5_spill] sm:$0xff] %v3642_v46  ;;  %v1274_v1 = vmul.f32 %v2891_v25, %v940_v39  ;;  %v939_v56 = vld [vmem:[#allocation2 + $0x151] sm:$0xff]  ;;  %v3653_v11 = vadd.f32 %v3536_v53, %v1204_v6  ;;  %v3657_v16 = vmul.f32 %v2894_v26, %v3632_v24  ;;  %v3660_v15 = vmul.f32 %v2902_v33, %v940_v39 }
 0x16f   : > { %v3662_v59 = vld [vmem:[#allocation2 + $0x152] sm:$0xff]  ;;  %v3664_v9 = vadd.f32 %v1371_v52, %v1303_v34  ;;  %v875_v48 = vmul.f32 %v2863_v47, %v839_v0  ;;  %v876_v37 = vmul.f32 %v2863_v47, %v840_v14  ;;  %v975_v31 = vmul.f32 %v2866_v49, %v939_v56  ;;  %1818 = vst.msk [vmem:[#allocation3 + $0x20] sm:$0xff] %vm279_vm0, %v1786_v21 }
 0x170   : > { %4290 = vst [vmem:[#allocation11_spill] sm:$0xff] %v3653_v11  ;;  %4291 = vst [vmem:[#allocation26_spill] sm:$0xff] %v3657_v16  ;;  %v1075_v6 = vmul.f32 %v2871_v58, %v3662_v59  ;;  %v1106_v53 = vadd.f32 %v3531_v12, %v1006_v2  ;;  %v1173_v39 = vmul.f32 %v2898_v28, %v839_v0  ;;  %v942_v27 = vld [vmem:[#allocation2 + $0x171] sm:$0xff] }
 0x171   : > { %4292 = vst [vmem:[#allocation15_spill] sm:$0xff] %v3660_v15  ;;  %4293 = vst [vmem:[#allocation6_spill] sm:$0xff] %v3664_v9  ;;  %v1174_v43 = vmul.f32 %v2898_v28, %v840_v14  ;;  %v1849_v52 = vld [vmem:[#allocation3 + $0x18] sm:$0xff]  ;;  %v1007_v34 = vadd.f32 %v975_v31, %v875_v48  ;;  %v1008_v16 = vadd.f32 %v976_v61, %v876_v37  ;;  %v3678_v11 = vld [vmem:[#allocation2 + $0x172] sm:$0xff] }
 0x172   : > { %v1273_v15 = vmul.f32 %v2891_v25, %v939_v56  ;;  %v1373_v24 = vmul.f32 %v2894_v26, %v3662_v59  ;;  %4294 = vst [vmem:[#allocation4_spill] sm:$0xff] %v3678_v11  ;;  %2541 = vmatmul.mubr.msk.f32.gmra.mrb[2].mxu1 %vm279_vm0, %v1849_v52  ;;  %v1205_v21 = vadd.f32 %v1173_v39, %v1105_v4 }
 0x173   : > { %v1206_v9 = vadd.f32 %v1174_v43, %v1106_v53  ;;  %v3682_v12 = vmul.f32 %v2905_v38, %v839_v0  ;;  %v3685_v2 = vmul.f32 %v2905_v38, %v840_v14  ;;  %v3687_v46 = vadd.f32 %v1075_v6, %v1007_v34  ;;  %v4298_v43 = vld [vmem:[#allocation19_spill] sm:$0xff] }
 0x174   : > { %v3690_v61 = vmul.f32 %v2902_v33, %v939_v56  ;;  %v1723_v48 = vadd.f32 %v3333_v50, %v3602_v40  ;;  %v3695_v37 = vmul.f32 %v2866_v49, %v942_v27  ;;  %v1305_v31 = vadd.f32 %v1273_v15, %v1205_v21 }
 0x175   : > { %v3697_v4 = vadd.f32 %v1274_v1, %v1206_v9  ;;  %v3701_v0 = vmul.f32 %v2871_v58, %v3678_v11  ;;  %v3704_v14 = vmul.f32 %v2891_v25, %v942_v27  ;;  %v3708_v56 = vmul.f32 %v2894_v26, %v3678_v11 }
 0x176   : > { %v1755_v6 = vmax.f32 %v1723_v48, 0.0  ;;  %v3711_v40 = vmul.f32 %v2902_v33, %v942_v27  ;;  %v1724_v15 = vadd.f32 %v3333_v50, %v3604_v22  ;;  %v3715_v1 = vadd.f32 %v1373_v24, %v1305_v31  ;;  %v1850_v34 = vld [vmem:[#allocation3 + $0x20] sm:$0xff]  ;;  %v4299_v27 = vld [vmem:[#allocation35_spill] sm:$0xff]  ;;  %v4300_v22 = vld [vmem:[#allocation25_spill] sm:$0xff] }
 0x177   : > { %4295 = vst [vmem:[#allocation8_spill] sm:$0xff] %v3708_v56  ;;  %v4297_v9 = vmax.f32 %v3593_v44, 0.0  ;;  %v3719_v39 = vadd.f32 %v1076_v36, %v1008_v16  ;;  %v1586_v52 = vadd.f32 %v4298_v43, %v3609_v60  ;;  %v728_v56 = vmax.f32 %v3613_v45, 0.0  ;;  %2543 = vmatprep.mubr.msk.f32.mxu1 %vm279_vm0, %v1850_v34  ;;  %v4301_v36 = vld [vmem:[#allocation40_spill] sm:$0xff]  ;;  %v4302_v16 = vld [vmem:[#allocation27_spill] sm:$0xff]  ;;  %v4303_v31 = vld [vmem:[#allocation18_spill] sm:$0xff] }
 0x178   : > { %4296 = vst [vmem:[#allocation32_spill] sm:$0xff] %v3711_v40  ;;  %v1787_v21 = vmin.f32 %v1755_v6, 6.0  ;;  %v1756_v48 = vmax.f32 %v1724_v15, 0.0  ;;  %v1587_v40 = vadd.f32 %v4299_v27, %v3617_v18  ;;  %v1655_v24 = vmul.f32 %v3304_v17, %v4300_v22  ;;  %v4304_v18 = vld [vmem:[#allocation21_spill] sm:$0xff]  ;;  %v4306_v27 = vld [vmem:[#allocation34_spill] sm:$0xff] }
 0x179   : > { %v757_v53 = vmin.f32 %v4297_v9, 6.0  ;;  %v1686_v44 = vadd.f32 %v3600_v30, %v1586_v52  ;;  %v689_v60 = vadd.f32 %v3565_v54, %v4301_v36  ;;  %v1388_v6 = vadd.f32 %v4303_v31, %v4302_v16  ;;  %v4305_v43 = vld [vmem:[#allocation41_spill] sm:$0xff]  ;;  %v4307_v54 = vld [vmem:[#allocation44_spill] sm:$0xff] }
 0x17a   : > { %1819 = vst.msk [vmem:[#allocation3 + $0x28] sm:$0xff] %vm279_vm0, %v1787_v21  ;;  %v1788_v45 = vmin.f32 %v1756_v48, 6.0  ;;  %v760_v15 = vmin.f32 %v728_v56, 6.0  ;;  %v1656_v9 = vmul.f32 %v3304_v17, %v4304_v18  ;;  %v1687_v52 = vadd.f32 %v1655_v24, %v1587_v40  ;;  %v4308_v48 = vld [vmem:[#allocation36_spill] sm:$0xff]  ;;  %v4309_v36 = vld [vmem:[#allocation37_spill] sm:$0xff]  ;;  %v4311_v18 = vld [vmem:[#allocation31_spill] sm:$0xff] }
 0x17b   : > { %804 = vst.msk [vmem:[#allocation2 + $0x169] sm:$0xff] %vm279_vm0, %v757_v53  ;;  %v1489_v53 = vadd.f32 %v3232_v62, %v4305_v43  ;;  %v1725_v30 = vadd.f32 %v3333_v50, %v1686_v44  ;;  %v727_v34 = vmax.f32 %v689_v60, 0.0  ;;  %v1488_v22 = vadd.f32 %v4306_v27, %v1388_v6  ;;  %v4310_v16 = vld [vmem:[#allocation28_spill] sm:$0xff]  ;;  %v4312_v60 = vld [vmem:[#allocation29_spill] sm:$0xff] }
 0x17c   : > { %1820 = vst.msk [vmem:[#allocation3 + $0x30] sm:$0xff] %vm279_vm0, %v1788_v45  ;;  %808 = vst.msk [vmem:[#allocation2 + $0x189] sm:$0xff] %vm279_vm0, %v760_v15  ;;  %v1657_v56 = vmul.f32 %v3304_v17, %v4308_v48  ;;  %v1390_v31 = vadd.f32 %v4310_v16, %v4309_v36  ;;  %v3751_v62 = vmul.f32 %v3304_v17, %v4311_v18  ;;  %v4313_v15 = vld [vmem:[#allocation43_spill] sm:$0xff]  ;;  %v4315_v16 = vld [vmem:[#allocation46_spill] sm:$0xff] }
 0x17d   : > { %v1589_v21 = vadd.f32 %v4307_v54, %v1489_v53  ;;  %v1757_v40 = vmax.f32 %v1725_v30, 0.0  ;;  %v1726_v44 = vadd.f32 %v3333_v50, %v1687_v52  ;;  %v759_v24 = vmin.f32 %v727_v34, 6.0  ;;  %v4314_v53 = vld [vmem:[#allocation48_spill] sm:$0xff]  ;;  %v4316_v52 = vld [vmem:[#allocation38_spill] sm:$0xff] }
 0x17e   : > { %v1588_v6 = vadd.f32 %v4312_v60, %v1488_v22  ;;  %v1490_v43 = vadd.f32 %v4313_v15, %v1390_v31  ;;  %v1491_v27 = vadd.f32 %v3270_v63, %v4314_v53  ;;  %v3760_v54 = vmul.f32 %v3304_v17, %v3241_v57  ;;  %v4317_v31 = vld [vmem:[#allocation39_spill] sm:$0xff]  ;;  %v4318_v15 = vld [vmem:[#allocation42_spill] sm:$0xff] }
 0x17f   : > { %v1689_v45 = vadd.f32 %v1657_v56, %v1589_v21  ;;  %v1789_v48 = vmin.f32 %v1757_v40, 6.0  ;;  %v1758_v36 = vmax.f32 %v1726_v44, 0.0  ;;  %807 = vst.msk [vmem:[#allocation2 + $0x181] sm:$0xff] %vm279_vm0, %v759_v24  ;;  %v1392_v34 = vadd.f32 %v4316_v52, %v4315_v16 }
 0x180   : > { %v1688_v30 = vadd.f32 %v1656_v9, %v1588_v6  ;;  %v1590_v60 = vadd.f32 %v4317_v31, %v1490_v43  ;;  %v1591_v63 = vadd.f32 %v3276_v10, %v1491_v27  ;;  %v3770_v57 = vmul.f32 %v3304_v17, %v4318_v15 }
 0x181   : > { %v1728_v56 = vadd.f32 %v3333_v50, %v1689_v45  ;;  %v1851_v40 = vld [vmem:[#allocation3 + $0x28] sm:$0xff]  ;;  %1821 = vst.msk [vmem:[#allocation3 + $0x38] sm:$0xff] %vm279_vm0, %v1789_v48 }
 0x182   : > { %v841_v18 = vld [vmem:[#allocation2 + $0x168] sm:$0xff]  ;;  %v842_v22 = vld [vmem:[#allocation2 + $0x170] sm:$0xff]  ;;  %2544 = vmatmul.mubr.msk.f32.gmra.mrb[4].mxu1 %vm279_vm0, %v1851_v40 }
 0x183   : > { %v941_v21 = vld [vmem:[#allocation2 + $0x169] sm:$0xff]  ;;  %v877_v44 = vmul.f32 %v2863_v47, %v841_v18  ;;  %v878_v9 = vmul.f32 %v2863_v47, %v842_v22  ;;  %v1175_v53 = vmul.f32 %v2898_v28, %v841_v18  ;;  %v1176_v45 = vmul.f32 %v2898_v28, %v842_v22  ;;  %v1852_v27 = vld [vmem:[#allocation3 + $0x30] sm:$0xff] }
 0x184   : > { %v977_v24 = vmul.f32 %v2866_v49, %v941_v21  ;;  %v3775_v6 = vld [vmem:[#allocation2 + $0x16a] sm:$0xff]  ;;  %v1275_v43 = vmul.f32 %v2891_v25, %v941_v21  ;;  %v3789_v48 = vmul.f32 %v2905_v38, %v841_v18  ;;  %2546 = vmatprep.mubr.msk.f32.mxu1 %vm279_vm0, %v1852_v27  ;;  %v3796_v40 = vmul.f32 %v2905_v38, %v842_v22 }
 0x185   : > { %v1077_v10 = vmul.f32 %v2871_v58, %v3775_v6  ;;  %v1375_v47 = vmul.f32 %v2894_v26, %v3775_v6  ;;  %v1010_v16 = vadd.f32 %v3695_v37, %v878_v9  ;;  %v1207_v52 = vadd.f32 %v1175_v53, %v3687_v46  ;;  %v1242_v31 = vld [vmem:[#allocation2 + $0x189] sm:$0xff] }
 0x186   : > { %v1009_v49 = vadd.f32 %v977_v24, %v877_v44  ;;  %v3791_v15 = vld [vmem:[#allocation2 + $0x18a] sm:$0xff]  ;;  %v1208_v58 = vadd.f32 %v1176_v45, %v3719_v39  ;;  %v3799_v11 = vmul.f32 %v2902_v33, %v941_v21  ;;  %v1278_v37 = vmul.f32 %v2891_v25, %v1242_v31  ;;  %v1141_v53 = vld [vmem:[#allocation2 + $0x180] sm:$0xff] }
 0x187   : > { %v1307_v46 = vadd.f32 %v1275_v43, %v1207_v52  ;;  %v3804_v18 = vmul.f32 %v2894_v26, %v3791_v15  ;;  %v3807_v9 = vmul.f32 %v2902_v33, %v1242_v31  ;;  %v1790_v39 = vmin.f32 %v1758_v36, 6.0  ;;  %v1142_v21 = vld [vmem:[#allocation2 + $0x188] sm:$0xff] }
 0x188   : > { %v1109_v44 = vadd.f32 %v1077_v10, %v1009_v49  ;;  %v3810_v24 = vadd.f32 %v3704_v14, %v1208_v58  ;;  %v1110_v22 = vadd.f32 %v3701_v0, %v1010_v16  ;;  %v1241_v45 = vld [vmem:[#allocation2 + $0x181] sm:$0xff]  ;;  %v1727_v27 = vadd.f32 %v3333_v50, %v1688_v30 }
 0x189   : > { %4319 = vst [vmem:[#allocation14_spill] sm:$0xff] %v3804_v18  ;;  %4320 = vst [vmem:[#allocation20_spill] sm:$0xff] %v3807_v9  ;;  %v3814_v10 = vadd.f32 %v1375_v47, %v1307_v46  ;;  %v1177_v43 = vmul.f32 %v2898_v28, %v1141_v53  ;;  %v1178_v49 = vmul.f32 %v2898_v28, %v1142_v21  ;;  %v3819_v31 = vld [vmem:[#allocation2 + $0x182] sm:$0xff]  ;;  %v1760_v58 = vmax.f32 %v1728_v56, 0.0 }
 0x18a   : > { %v1277_v52 = vmul.f32 %v2891_v25, %v1241_v45  ;;  %v1853_v14 = vld [vmem:[#allocation3 + $0x38] sm:$0xff]  ;;  %1822 = vst.msk [vmem:[#allocation3 + $0x40] sm:$0xff] %vm279_vm0, %v1790_v39  ;;  %v1377_v0 = vmul.f32 %v2894_v26, %v3819_v31  ;;  %v3825_v36 = vmul.f32 %v2905_v38, %v1141_v53  ;;  %v3828_v30 = vmul.f32 %v2905_v38, %v1142_v21 }
 0x18b   : > { %v3831_v47 = vmul.f32 %v2902_v33, %v1241_v45  ;;  %2547 = vmatmul.mubr.msk.f32.gmra.mrb[6].mxu1 %vm279_vm0, %v1853_v14  ;;  %v1209_v25 = vadd.f32 %v1177_v43, %v1109_v44  ;;  %v1210_v28 = vadd.f32 %v1178_v49, %v1110_v22  ;;  %v1759_v16 = vmax.f32 %v1727_v27, 0.0  ;;  %v4321_v22 = vld [vmem:[#allocation47_spill] sm:$0xff] }
 0x18c   : > { %v1690_v46 = vadd.f32 %v3751_v62, %v1590_v60  ;;  %v1691_v39 = vadd.f32 %v3760_v54, %v1591_v63  ;;  %v1492_v26 = vadd.f32 %v3273_v55, %v1392_v34  ;;  %v1493_v53 = vadd.f32 %v3395_v7, %v3313_v23  ;;  %v4322_v23 = vld [vmem:[#allocation45_spill] sm:$0xff] }
 0x18d   : > { %v1309_v21 = vadd.f32 %v1277_v52, %v1209_v25  ;;  %v3839_v18 = vadd.f32 %v1278_v37, %v1210_v28  ;;  %v1791_v45 = vmin.f32 %v1759_v16, 6.0  ;;  %v1792_v9 = vmin.f32 %v1760_v58, 6.0  ;;  %v4323_v54 = vld [vmem:[#allocation49_spill] sm:$0xff]  ;;  %v4326_v25 = vld [vmem:[#allocation50_spill] sm:$0xff] }
 0x18e   : > { %v1729_v14 = vadd.f32 %v3333_v50, %v1690_v46  ;;  %v1730_v44 = vadd.f32 %v3333_v50, %v1691_v39  ;;  %v1592_v56 = vadd.f32 %v4321_v22, %v1492_v26  ;;  %v1593_v62 = vadd.f32 %v3402_v5, %v1493_v53  ;;  %v4324_v52 = vld [vmem:[#allocation53_spill] sm:$0xff]  ;;  %v4329_v26 = vld [vmem:[#allocation58_spill] sm:$0xff]  ;;  %v4330_v53 = vld [vmem:[#allocation52_spill] sm:$0xff] }
 0x18f   : > { %v3845_v60 = vadd.f32 %v1377_v0, %v1309_v21  ;;  %1823 = vst.msk [vmem:[#allocation3 + $0x48] sm:$0xff] %vm279_vm0, %v1791_v45  ;;  %1824 = vst.msk [vmem:[#allocation3 + $0x50] sm:$0xff] %vm279_vm0, %v1792_v9  ;;  %v1661_v55 = vmul.f32 %v3304_v17, %v3380_v42  ;;  %v1394_v7 = vadd.f32 %v4322_v23, %v3294_v35  ;;  %v4325_v0 = vld [vmem:[#allocation54_spill] sm:$0xff]  ;;  %v4332_v23 = vld [vmem:[#allocation56_spill] sm:$0xff] }
 0x190   : > { %v1662_v34 = vmul.f32 %v3304_v17, %v4323_v54  ;;  %v1761_v63 = vmax.f32 %v1729_v14, 0.0  ;;  %v1762_v37 = vmax.f32 %v1730_v44, 0.0  ;;  %v1692_v27 = vadd.f32 %v3770_v57, %v1592_v56  ;;  %v4327_v57 = vld [vmem:[#allocation59_spill] sm:$0xff]  ;;  %v4333_v54 = vld [vmem:[#allocation60_spill] sm:$0xff] }
 0x191   : > { %v1495_v5 = vadd.f32 %v3436_v41, %v3421_v29  ;;  %v1854_v43 = vld [vmem:[#allocation3 + $0x40] sm:$0xff]  ;;  %v1693_v49 = vadd.f32 %v1661_v55, %v1593_v62  ;;  %v1494_v9 = vadd.f32 %v3399_v13, %v1394_v7  ;;  %v1663_v42 = vmul.f32 %v3304_v17, %v4324_v52  ;;  %v4328_v41 = vld [vmem:[#allocation51_spill] sm:$0xff]  ;;  %v4335_v52 = vld [vmem:[#allocation57_spill] sm:$0xff] }
 0x192   : > { %v1396_v35 = vadd.f32 %v4326_v25, %v4325_v0  ;;  %2549 = vmatprep.mubr.msk.f32.mxu1 %vm279_vm0, %v1854_v43  ;;  %v1793_v28 = vmin.f32 %v1761_v63, 6.0  ;;  %v1794_v16 = vmin.f32 %v1762_v37, 6.0  ;;  %v1731_v58 = vadd.f32 %v3333_v50, %v1692_v27  ;;  %v4331_v44 = vld [vmem:[#allocation63_spill] sm:$0xff]  ;;  %v4336_v0 = vld [vmem:[#allocation65_spill] sm:$0xff] }
 0x193   : > { %v1595_v46 = vadd.f32 %v4327_v57, %v1495_v5  ;;  %v1732_v29 = vadd.f32 %v3333_v50, %v1693_v49  ;;  %v1594_v39 = vadd.f32 %v4328_v41, %v1494_v9  ;;  %v1664_v21 = vmul.f32 %v3304_v17, %v4330_v53  ;;  %v4334_v63 = vld [vmem:[#allocation55_spill] sm:$0xff]  ;;  %v4339_v41 = vld [vmem:[#allocation62_spill] sm:$0xff] }
 0x194   : > { %v1496_v13 = vadd.f32 %v4329_v26, %v1396_v35  ;;  %1825 = vst.msk [vmem:[#allocation3 + $0x58] sm:$0xff] %vm279_vm0, %v1793_v28  ;;  %1826 = vst.msk [vmem:[#allocation3 + $0x60] sm:$0xff] %vm279_vm0, %v1794_v16  ;;  %v1763_v45 = vmax.f32 %v1731_v58, 0.0  ;;  %v1497_v22 = vadd.f32 %v3474_v3, %v4331_v44  ;;  %v1665_v56 = vmul.f32 %v3304_v17, %v3444_v51  ;;  %v4337_v16 = vld [vmem:[#allocation71_spill] sm:$0xff]  ;;  %v4338_v58 = vld [vmem:[#allocation66_spill] sm:$0xff] }
 0x195   : > { %v1695_v14 = vadd.f32 %v1663_v42, %v1595_v46  ;;  %v1764_v62 = vmax.f32 %v1732_v29, 0.0  ;;  %v1694_v55 = vadd.f32 %v1662_v34, %v1594_v39  ;;  %v1398_v37 = vadd.f32 %v4334_v63, %v4333_v54  ;;  %v4340_v26 = vld [vmem:[#allocation67_spill] sm:$0xff]  ;;  %v4344_v54 = vld [vmem:[#allocation72_spill] sm:$0xff] }
 0x196   : > { %v1596_v7 = vadd.f32 %v4332_v23, %v1496_v13  ;;  %v1855_v27 = vld [vmem:[#allocation3 + $0x48] sm:$0xff]  ;;  %v1856_v5 = vld [vmem:[#allocation3 + $0x50] sm:$0xff]  ;;  %v1795_v43 = vmin.f32 %v1763_v45, 6.0  ;;  %v1597_v9 = vadd.f32 %v3480_v19, %v1497_v22  ;;  %v1666_v3 = vmul.f32 %v3304_v17, %v4335_v52  ;;  %v4343_v22 = vld [vmem:[#allocation64_spill] sm:$0xff] }
 0x197   : > { %v1734_v49 = vadd.f32 %v3333_v50, %v1695_v14  ;;  %2550 = vmatmul.mubr.msk.f32.gmra.mrb[8].mxu1 %vm279_vm0, %v1855_v27  ;;  %v1796_v51 = vmin.f32 %v1764_v62, 6.0  ;;  %v1733_v34 = vadd.f32 %v3333_v50, %v1694_v55  ;;  %v1498_v25 = vadd.f32 %v4336_v0, %v1398_v37  ;;  %v4341_v13 = vld [vmem:[#allocation61_spill] sm:$0xff]  ;;  %v4349_v0 = vld [vmem:[#allocation68_spill] sm:$0xff] }
 0x198   : > { %v1696_v42 = vadd.f32 %v1664_v21, %v1596_v7  ;;  %2552 = vmatprep.mubr.msk.f32.mxu1 %vm279_vm0, %v1856_v5  ;;  %1827 = vst.msk [vmem:[#allocation3 + $0x68] sm:$0xff] %vm279_vm0, %v1795_v43  ;;  %v1697_v28 = vadd.f32 %v1665_v56, %v1597_v9  ;;  %v1499_v19 = vadd.f32 %v4337_v16, %v3500_v32  ;;  %v4342_v14 = vld [vmem:[#allocation73_spill] sm:$0xff]  ;;  %v4350_v16 = vld [vmem:[#allocation70_spill] sm:$0xff] }
 0x199   : > { %v1766_v35 = vmax.f32 %v1734_v49, 0.0  ;;  %v1667_v57 = vmul.f32 %v3304_v17, %v4338_v58  ;;  %1828 = vst.msk [vmem:[#allocation3 + $0x70] sm:$0xff] %vm279_vm0, %v1796_v51  ;;  %v1765_v46 = vmax.f32 %v1733_v34, 0.0  ;;  %v1598_v39 = vadd.f32 %v4339_v41, %v1498_v25  ;;  %v4345_v5 = vld [vmem:[#allocation77_spill] sm:$0xff]  ;;  %v4346_v49 = vld [vmem:[#allocation7_spill] sm:$0xff] }
 0x19a   : > { %v1735_v29 = vadd.f32 %v3333_v50, %v1696_v42  ;;  %v1400_v53 = vadd.f32 %v4341_v13, %v4340_v26  ;;  %v1736_v45 = vadd.f32 %v3333_v50, %v1697_v28  ;;  %v1599_v44 = vadd.f32 %v4342_v14, %v1499_v19  ;;  %v4347_v51 = vld [vmem:[#allocation69_spill] sm:$0xff]  ;;  %v4348_v42 = vld [vmem:[#allocation74_spill] sm:$0xff]  ;;  %v4354_v14 = vld [vmem:[#allocation75_spill] sm:$0xff] }
 0x19b   : > { %v1798_v21 = vmin.f32 %v1766_v35, 6.0  ;;  %v1668_v32 = vmul.f32 %v3304_v17, %v4343_v22  ;;  %v1857_v56 = vld [vmem:[#allocation3 + $0x58] sm:$0xff]  ;;  %v1858_v62 = vld [vmem:[#allocation3 + $0x60] sm:$0xff]  ;;  %v1797_v55 = vmin.f32 %v1765_v46, 6.0  ;;  %v1698_v7 = vadd.f32 %v1666_v3, %v1598_v39  ;;  %v4352_v39 = vld [vmem:[#allocation6_spill] sm:$0xff] }
 0x19c   : > { %v1767_v23 = vmax.f32 %v1735_v29, 0.0  ;;  %v1500_v63 = vadd.f32 %v4344_v54, %v1400_v53  ;;  %2553 = vmatmul.mubr.msk.f32.gmra.mrb[10].mxu1 %vm279_vm0, %v1857_v56  ;;  %v1768_v37 = vmax.f32 %v1736_v45, 0.0  ;;  %v1699_v27 = vadd.f32 %v1667_v57, %v1599_v44  ;;  %v4351_v29 = vld [vmem:[#allocation5_spill] sm:$0xff]  ;;  %v4353_v45 = vld [vmem:[#allocation11_spill] sm:$0xff]  ;;  %v4355_v56 = vld [vmem:[#allocation76_spill] sm:$0xff] }
 0x19d   : > { %1830 = vst.msk [vmem:[#allocation3 + $0x80] sm:$0xff] %vm279_vm0, %v1798_v21  ;;  %v1501_v43 = vadd.f32 %v3638_v20, %v4345_v5  ;;  %v1669_v9 = vmul.f32 %v3304_v17, %v4346_v49  ;;  %2555 = vmatprep.mubr.msk.f32.mxu1 %vm279_vm0, %v1858_v62  ;;  %1829 = vst.msk [vmem:[#allocation3 + $0x78] sm:$0xff] %vm279_vm0, %v1797_v55  ;;  %v1737_v3 = vadd.f32 %v3333_v50, %v1698_v7  ;;  %v4357_v49 = vld [vmem:[#allocation15_spill] sm:$0xff] }
 0x19e   : > { %v1799_v52 = vmin.f32 %v1767_v23, 6.0  ;;  %v1600_v34 = vadd.f32 %v4347_v51, %v1500_v63  ;;  %v1402_v25 = vadd.f32 %v4349_v0, %v4348_v42  ;;  %v1800_v35 = vmin.f32 %v1768_v37, 6.0 }
 0x19f   : > { %v1738_v28 = vadd.f32 %v3333_v50, %v1699_v27  ;;  %v1601_v20 = vadd.f32 %v3645_v8, %v1501_v43  ;;  %v1670_v19 = vmul.f32 %v3304_v17, %v4350_v16  ;;  %v1859_v58 = vld [vmem:[#allocation3 + $0x68] sm:$0xff]  ;;  %v1769_v57 = vmax.f32 %v1737_v3, 0.0  ;;  %v4358_v3 = vld [vmem:[#allocation26_spill] sm:$0xff] }
 0x1a0   : > { %1831 = vst.msk [vmem:[#allocation3 + $0x88] sm:$0xff] %vm279_vm0, %v1799_v52  ;;  %v1700_v46 = vadd.f32 %v1668_v32, %v1600_v34  ;;  %v1502_v41 = vadd.f32 %v4351_v29, %v1402_v25  ;;  %v1503_v26 = vadd.f32 %v3682_v12, %v4352_v39  ;;  %2556 = vmatmul.mubr.msk.f32.gmra.mrb[12].mxu1 %vm279_vm0, %v1859_v58  ;;  %v1860_v13 = vld [vmem:[#allocation3 + $0x70] sm:$0xff]  ;;  %1832 = vst.msk [vmem:[#allocation3 + $0x90] sm:$0xff] %vm279_vm0, %v1800_v35 }
 0x1a1   : > { %v1770_v53 = vmax.f32 %v1738_v28, 0.0  ;;  %v1701_v8 = vadd.f32 %v1669_v9, %v1601_v20  ;;  %v1671_v21 = vmul.f32 %v3304_v17, %v3662_v59  ;;  %v1404_v44 = vadd.f32 %v4354_v14, %v4353_v45  ;;  %2558 = vmatprep.mubr.msk.f32.mxu1 %vm279_vm0, %v1860_v13  ;;  %v3938_v17 = vld [vmem:[%s4164_s3 + $0x8] ss:$0 sm:$0xff]  ;;  %v4356_v59 = vld [vmem:[#allocation12_spill] sm:$0xff]  ;;  %v1541_v13 = vld [vmem:[#allocation2 + $0x199] sm:$0xff] }
 0x1a2   : > { %v1801_v22 = vmin.f32 %v1769_v57, 6.0  ;;  %v1739_v32 = vadd.f32 %v3333_v50, %v1700_v46  ;;  %v1602_v12 = vadd.f32 %v4355_v56, %v1502_v41  ;;  %v1603_v62 = vadd.f32 %v3690_v61, %v1503_v26  ;;  %v4360_v57 = vld [vmem:[#allocation32_spill] sm:$0xff]  ;;  %v1441_v26 = vld [vmem:[#allocation2 + $0x198] sm:$0xff] }
 0x1a3   : > { %v1802_v55 = vmin.f32 %v1770_v53, 6.0  ;;  %v1740_v23 = vadd.f32 %v3333_v50, %v1701_v8  ;;  %v1504_v7 = vadd.f32 %v3685_v2, %v1404_v44  ;;  %v1672_v54 = vmul.f32 %v3938_v17, %v4356_v59  ;;  %v4361_v41 = vld [vmem:[#allocation8_spill] sm:$0xff] }
 0x1a4   : > { %v1862_v63 = vld [vmem:[#allocation3 + $0x80] sm:$0xff]  ;;  %1833 = vst.msk [vmem:[#allocation3 + $0x98] sm:$0xff] %vm279_vm0, %v1801_v22  ;;  %v1771_v37 = vmax.f32 %v1739_v32, 0.0  ;;  %v1702_v27 = vadd.f32 %v1670_v19, %v1602_v12  ;;  %v1703_v5 = vadd.f32 %v1671_v21, %v1603_v62  ;;  %v1505_v61 = vadd.f32 %v3789_v48, %v3715_v1  ;;  %v1861_v43 = vld [vmem:[#allocation3 + $0x78] sm:$0xff]  ;;  %v1641_v21 = vld [vmem:[#allocation2 + $0x19a] sm:$0xff] }
 0x1a5   : > { %1834 = vst.msk [vmem:[#allocation3 + $0xa0] sm:$0xff] %vm279_vm0, %v1802_v55  ;;  %v1772_v2 = vmax.f32 %v1740_v23, 0.0  ;;  %v1604_v9 = vadd.f32 %v4357_v49, %v1504_v7  ;;  %v1673_v52 = vmul.f32 %v3938_v17, %v3775_v6  ;;  %v1406_v51 = vadd.f32 %v4358_v3, %v3697_v4  ;;  %2559 = vmatmul.mubr.msk.f32.gmra.mrb[14].mxu1 %vm279_vm0, %v1861_v43  ;;  %v4359_v6 = vld [vmem:[#allocation4_spill] sm:$0xff]  ;;  %v1442_v62 = vld [vmem:[#allocation2 + $0x1a0] sm:$0xff] }
 0x1a6   : > { %v1803_v34 = vmin.f32 %v1771_v37, 6.0  ;;  %v1741_v42 = vadd.f32 %v3333_v50, %v1702_v27  ;;  %v1742_v0 = vadd.f32 %v3333_v50, %v1703_v5  ;;  %v1605_v1 = vadd.f32 %v3799_v11, %v1505_v61  ;;  %2561 = vmatprep.mubr.msk.f32.mxu1 %vm279_vm0, %v1862_v63  ;;  %v3966_v11 = vld [vmem:[%s4165_s4] ss:$0 sm:$0xff]  ;;  %v1542_v55 = vld [vmem:[#allocation2 + $0x1a1] sm:$0xff] }
 0x1a7   : > { %v1863_v48 = vld [vmem:[#allocation3 + $0x88] sm:$0xff]  ;;  %v1804_v25 = vmin.f32 %v1772_v2, 6.0  ;;  %v1704_v35 = vadd.f32 %v1672_v54, %v1604_v9  ;;  %v1506_v28 = vadd.f32 %v3796_v40, %v1406_v51  ;;  %v1674_v20 = vmul.f32 %v3938_v17, %v4359_v6  ;;  %v1864_v4 = vld [vmem:[#allocation3 + $0x90] sm:$0xff] }
 0x1a8   : > { %1835 = vst.msk [vmem:[#allocation3 + $0xa8] sm:$0xff] %vm279_vm0, %v1803_v34  ;;  %v1773_v16 = vmax.f32 %v1741_v42, 0.0  ;;  %v1774_v19 = vmax.f32 %v1742_v0, 0.0  ;;  %v1705_v58 = vadd.f32 %v1673_v52, %v1605_v1  ;;  %v1507_v50 = vadd.f32 %v3825_v36, %v3814_v10  ;;  %v4363_v27 = vld [vmem:[#allocation14_spill] sm:$0xff] }
 0x1a9   : > { %1836 = vst.msk [vmem:[#allocation3 + $0xb0] sm:$0xff] %vm279_vm0, %v1804_v25  ;;  %v1743_v40 = vadd.f32 %v3966_v11, %v1704_v35  ;;  %v1606_v46 = vadd.f32 %v4360_v57, %v1506_v28  ;;  %v1675_v29 = vmul.f32 %v3938_v17, %v3819_v31  ;;  %v1408_v39 = vadd.f32 %v4361_v41, %v3810_v24  ;;  %v1642_v61 = vld [vmem:[#allocation2 + $0x1a2] sm:$0xff] }
 0x1aa   : > { %2562 = vmatmul.mubr.msk.f32.gmra.mrb[16].mxu1 %vm279_vm0, %v1863_v48  ;;  %v1805_v10 = vmin.f32 %v1773_v16, 6.0  ;;  %v1806_v36 = vmin.f32 %v1774_v19, 6.0  ;;  %v1744_v53 = vadd.f32 %v3966_v11, %v1705_v58  ;;  %v1607_v8 = vadd.f32 %v3831_v47, %v1507_v50 }
 0x1ab   : > { %2564 = vmatprep.mubr.msk.f32.mxu1 %vm279_vm0, %v1864_v4  ;;  %v1865_v45 = vld [vmem:[#allocation3 + $0x98] sm:$0xff]  ;;  %v1775_v14 = vmax.f32 %v1743_v40, 0.0  ;;  %v1706_v44 = vadd.f32 %v1674_v20, %v1606_v46  ;;  %v1508_v31 = vadd.f32 %v3828_v30, %v1408_v39  ;;  %v1676_v24 = vmul.f32 %v3938_v17, %v3791_v15  ;;  %v4362_v30 = vld [vmem:[#allocation20_spill] sm:$0xff]  ;;  %v4021_v39 = vld [vmem:[%s4167_s6] ss:$0 sm:$0xff] }
 0x1ac   : > { %v1866_v22 = vld [vmem:[#allocation3 + $0xa0] sm:$0xff]  ;;  %1837 = vst.msk [vmem:[#allocation3 + $0xb8] sm:$0xff] %vm279_vm0, %v1805_v10  ;;  %1838 = vst.msk [vmem:[#allocation3 + $0xc0] sm:$0xff] %vm279_vm0, %v1806_v36  ;;  %v1776_v32 = vmax.f32 %v1744_v53, 0.0  ;;  %v1707_v56 = vadd.f32 %v1675_v29, %v1607_v8  ;;  %v1477_v47 = vmul.f32 %v2905_v38, %v1441_v26  ;;  %v1577_v12 = vmul.f32 %v2902_v33, %v1541_v13  ;;  %v2605_v53 = vld [vmem:[%s2769_s9 + $0x8] sm:$0xff] }
 0x1ad   : > { %v1807_v23 = vmin.f32 %v1775_v14, 6.0  ;;  %v1745_v7 = vadd.f32 %v3966_v11, %v1706_v44  ;;  %v1608_v59 = vadd.f32 %v4362_v30, %v1508_v31  ;;  %v1677_v15 = vmul.f32 %v3938_v17, %v1641_v21  ;;  %v2606_v21 = vld [vmem:[%s2769_s9] sm:$0xff] }
 0x1ae   : > { %2565 = vmatmul.mubr.msk.f32.gmra.mrb[18].mxu1 %vm279_vm0, %v1865_v45  ;;  %v1808_v54 = vmin.f32 %v1776_v32, 6.0  ;;  %v1746_v63 = vadd.f32 %v3966_v11, %v1707_v56  ;;  %v1509_v37 = vadd.f32 %v1477_v47, %v3845_v60  ;;  %v1410_v5 = vadd.f32 %v4363_v27, %v3839_v18  ;;  %v2608_v56 = vld [vmem:[%s2769_s9 + $0x10] sm:$0xff] }
 0x1af   : > { %2567 = vmatprep.mubr.msk.f32.mxu1 %vm279_vm0, %v1866_v22  ;;  %v1867_v43 = vld [vmem:[#allocation3 + $0xa8] sm:$0xff]  ;;  %1839 = vst.msk [vmem:[#allocation3 + $0xc8] sm:$0xff] %vm279_vm0, %v1807_v23  ;;  %v1777_v2 = vmax.f32 %v1745_v7, 0.0  ;;  %v1708_v49 = vadd.f32 %v1676_v24, %v1608_v59  ;;  %v1478_v9 = vmul.f32 %v2905_v38, %v1442_v62  ;;  %v1578_v52 = vmul.f32 %v2902_v33, %v1542_v55  ;;  %v2609_v7 = vld [vmem:[%s2769_s9 + $0x28] sm:$0xff]  ;;  %v2610_v59 = vld [vmem:[%s2769_s9 + $0x20] sm:$0xff] }
 0x1b0   : > { %v1868_v3 = vld [vmem:[#allocation3 + $0xb0] sm:$0xff]  ;;  %1840 = vst.msk [vmem:[#allocation3 + $0xd0] sm:$0xff] %vm279_vm0, %v1808_v54  ;;  %v1778_v51 = vmax.f32 %v1746_v63, 0.0  ;;  %v1609_v60 = vadd.f32 %v1577_v12, %v1509_v37  ;;  %v1678_v0 = vmul.f32 %v3938_v17, %v1642_v61  ;;  %v2607_v22 = vld [vmem:[%s2769_s9 + $0x18] sm:$0xff] }
 0x1b1   : > { %v1809_v34 = vmin.f32 %v1777_v2, 6.0  ;;  %v1747_v18 = vadd.f32 %v3966_v11, %v1708_v49  ;;  %v1510_v42 = vadd.f32 %v1478_v9, %v1410_v5  ;;  %v2611_v5 = vld [vmem:[%s2769_s9 + $0x38] sm:$0xff] }
 0x1b2   : > { %2568 = vmatmul.mubr.msk.f32.gmra.mrb[20].mxu1 %vm279_vm0, %v1867_v43  ;;  %v1810_v1 = vmin.f32 %v1778_v51, 6.0  ;;  %v1709_v48 = vadd.f32 %v1677_v15, %v1609_v60  ;;  %v2612_v43 = vld [vmem:[%s2769_s9 + $0x30] sm:$0xff]  ;;  %v2613_v51 = vld [vmem:[%s2769_s9 + $0x48] sm:$0xff] }
 0x1b3   : > { %2570 = vmatprep.mubr.msk.f32.mxu1 %vm279_vm0, %v1868_v3  ;;  %v1869_v38 = vld [vmem:[#allocation3 + $0xb8] sm:$0xff]  ;;  %1841 = vst.msk [vmem:[#allocation3 + $0xd8] sm:$0xff] %vm279_vm0, %v1809_v34  ;;  %v1779_v33 = vmax.f32 %v1747_v18, 0.0  ;;  %v1610_v25 = vadd.f32 %v1578_v52, %v1510_v42  ;;  %v1870_v35 = vld [vmem:[#allocation3 + $0xc0] sm:$0xff]  ;;  %v2614_v34 = vld [vmem:[%s2769_s9 + $0x40] sm:$0xff] }
 0x1b4   : > { %1842 = vst.msk [vmem:[#allocation3 + $0xe0] sm:$0xff] %vm279_vm0, %v1810_v1  ;;  %v1748_v28 = vadd.f32 %v3966_v11, %v1709_v48 }
 0x1b5   : > { %v1811_v6 = vmin.f32 %v1779_v33, 6.0  ;;  %v1710_v20 = vadd.f32 %v1678_v0, %v1610_v25  ;;  %v2616_v25 = vld [vmem:[%s2769_s9 + $0x50] sm:$0xff] }
 0x1b6   : > { %2571 = vmatmul.mubr.msk.f32.gmra.mrb[22].mxu1 %vm279_vm0, %v1869_v38  ;;  %v1780_v17 = vmax.f32 %v1748_v28, 0.0  ;;  %v1871_v4 = vld [vmem:[#allocation3 + $0xc8] sm:$0xff] }
 0x1b7   : > { %2573 = vmatprep.mubr.msk.f32.mxu1 %vm279_vm0, %v1870_v35  ;;  %1843 = vst.msk [vmem:[#allocation3 + $0xe8] sm:$0xff] %vm279_vm0, %v1811_v6  ;;  %v1749_v16 = vadd.f32 %v3966_v11, %v1710_v20  ;;  %v1872_v19 = vld [vmem:[#allocation3 + $0xd0] sm:$0xff]  ;;  %v2615_v38 = vld [vmem:[%s2769_s9 + $0x58] sm:$0xff] }
 0x1b8   : > { %v1812_v58 = vmin.f32 %v1780_v17, 6.0 }
 0x1b9   : > { %v1781_v50 = vmax.f32 %v1749_v16, 0.0 }
 0x1ba   : > { %2574 = vmatmul.mubr.msk.f32.gmra.mrb[24].mxu1 %vm279_vm0, %v1871_v4  ;;  %1844 = vst.msk [vmem:[#allocation3 + $0xf0] sm:$0xff] %vm279_vm0, %v1812_v58  ;;  %v1873_v40 = vld [vmem:[#allocation3 + $0xd8] sm:$0xff] }
 0x1bb   : > { %2576 = vmatprep.mubr.msk.f32.mxu1 %vm279_vm0, %v1872_v19  ;;  %v1813_v57 = vmin.f32 %v1781_v50, 6.0  ;;  %v1874_v46 = vld [vmem:[#allocation3 + $0xe0] sm:$0xff]  ;;  %v2617_v4 = vld [vmem:[%s2769_s9 + $0x68] sm:$0xff]  ;;  %v2618_v19 = vld [vmem:[%s2769_s9 + $0x60] sm:$0xff] }
 0x1bd   : > { %1845 = vst.msk [vmem:[#allocation3 + $0xf8] sm:$0xff] %vm279_vm0, %v1813_v57 }
 0x1be   : > { %2577 = vmatmul.mubr.msk.f32.gmra.mrb[26].mxu1 %vm279_vm0, %v1873_v40  ;;  %v1875_v11 = vld [vmem:[#allocation3 + $0xe8] sm:$0xff] }
 0x1bf   : > { %2579 = vmatprep.mubr.msk.f32.mxu1 %vm279_vm0, %v1874_v46 }
 0x1c1   : > { %v1876_v29 = vld [vmem:[#allocation3 + $0xf0] sm:$0xff] }
 0x1c2   : > { %2580 = vmatmul.mubr.msk.f32.gmra.mrb[28].mxu1 %vm279_vm0, %v1875_v11  ;;  %v2619_v11 = vld [vmem:[%s2769_s9 + $0x78] sm:$0xff] }
 0x1c3   : > { %2582 = vmatprep.mubr.msk.f32.mxu1 %vm279_vm0, %v1876_v29 }
 0x1c4   : > { %v1877_v41 = vld [vmem:[#allocation3 + $0xf8] sm:$0xff] }
 0x1c6   : > { %2583 = vmatmul.mubr.msk.f32.gmra.mrb[30].mxu1 %vm279_vm0, %v1877_v41  ;;  %v2620_v41 = vld [vmem:[%s2769_s9 + $0x70] sm:$0xff] }
 0x23f   : > { %v2539_v26 = vpop.f32.mrb[0].mxu1 }
 0x240   : > { %v2057_v13 = vadd.f32 %v2539_v26, %v4021_v39  ;;  %v2051_v10 = vpop.f32.mrb[1].mxu1 }
 0x241   : > { %v2052_v36 = vadd.f32 %v4021_v39, %v2051_v10 }
 0x242   : > { %v2211_v8 = vadd.f32 %v2605_v53, %v2057_v13 }
 0x243   : > { %v2210_v45 = vadd.f32 %v2606_v21, %v2052_v36 }
 0x244   : > { %2243 = vst.msk [vmem:[%s4029_s17 + $0x8] sm:$0xff] %vm375_vm2, %v2211_v8  ;;  %v2621_v8 = vld [vmem:[%s2769_s9 + $0x88] sm:$0xff] }
 0x245   : > { %2242 = vst.msk [vmem:[%s4029_s17] sm:$0xff] %vm375_vm2, %v2210_v45  ;;  %v2542_v14 = vpop.f32.mrb[2].mxu1  ;;  %v2622_v45 = vld [vmem:[%s2769_s9 + $0x80] sm:$0xff] }
 0x246   : > { %v2067_v44 = vadd.f32 %v2542_v14, %v4021_v39  ;;  %v2061_v31 = vpop.f32.mrb[3].mxu1 }
 0x247   : > { %v2062_v24 = vadd.f32 %v4021_v39, %v2061_v31 }
 0x248   : > { %v2213_v32 = vadd.f32 %v2607_v22, %v2067_v44 }
 0x249   : > { %v2212_v47 = vadd.f32 %v2608_v56, %v2062_v24 }
 0x24a   : > { %2245 = vst.msk [vmem:[%s4029_s17 + $0x18] sm:$0xff] %vm375_vm2, %v2213_v32  ;;  %v2623_v32 = vld [vmem:[%s2769_s9 + $0x98] sm:$0xff] }
 0x24b   : > { %2244 = vst.msk [vmem:[%s4029_s17 + $0x10] sm:$0xff] %vm375_vm2, %v2212_v47  ;;  %v2624_v47 = vld [vmem:[%s2769_s9 + $0x90] sm:$0xff] }
 0x255   : > { %v2545_v12 = vpop.f32.mrb[4].mxu1 }
 0x256   : > { %v2077_v62 = vadd.f32 %v2545_v12, %v4021_v39  ;;  %v2071_v55 = vpop.f32.mrb[5].mxu1 }
 0x257   : > { %v2072_v23 = vadd.f32 %v4021_v39, %v2071_v55 }
 0x258   : > { %v2215_v30 = vadd.f32 %v2609_v7, %v2077_v62 }
 0x259   : > { %v2214_v15 = vadd.f32 %v2610_v59, %v2072_v23 }
 0x25a   : > { %2247 = vst.msk [vmem:[%s4029_s17 + $0x28] sm:$0xff] %vm375_vm2, %v2215_v30  ;;  %v2625_v30 = vld [vmem:[%s2769_s9 + $0xa8] sm:$0xff] }
 0x25b   : > { %2246 = vst.msk [vmem:[%s4029_s17 + $0x20] sm:$0xff] %vm375_vm2, %v2214_v15  ;;  %v2626_v15 = vld [vmem:[%s2769_s9 + $0xa0] sm:$0xff] }
 0x25e   : > { %v2548_v54 = vpop.f32.mrb[6].mxu1 }
 0x25f   : > { %v2087_v63 = vadd.f32 %v2548_v54, %v4021_v39  ;;  %v2081_v37 = vpop.f32.mrb[7].mxu1 }
 0x260   : > { %v2082_v27 = vadd.f32 %v4021_v39, %v2081_v37 }
 0x261   : > { %v2217_v61 = vadd.f32 %v2611_v5, %v2087_v63 }
 0x262   : > { %v2216_v2 = vadd.f32 %v2612_v43, %v2082_v27 }
 0x263   : > { %2249 = vst.msk [vmem:[%s4029_s17 + $0x38] sm:$0xff] %vm375_vm2, %v2217_v61  ;;  %v2627_v61 = vld [vmem:[%s2769_s9 + $0xb8] sm:$0xff] }
 0x264   : > { %2248 = vst.msk [vmem:[%s4029_s17 + $0x30] sm:$0xff] %vm375_vm2, %v2216_v2  ;;  %v2628_v2 = vld [vmem:[%s2769_s9 + $0xb0] sm:$0xff] }
 0x26a   : > { %v2551_v49 = vpop.f32.mrb[8].mxu1 }
 0x26b   : > { %v2097_v9 = vadd.f32 %v2551_v49, %v4021_v39  ;;  %v2091_v52 = vpop.f32.mrb[9].mxu1 }
 0x26c   : > { %v2092_v3 = vadd.f32 %v4021_v39, %v2091_v52 }
 0x26d   : > { %v2219_v60 = vadd.f32 %v2613_v51, %v2097_v9 }
 0x26e   : > { %v2218_v18 = vadd.f32 %v2614_v34, %v2092_v3 }
 0x26f   : > { %2251 = vst.msk [vmem:[%s4029_s17 + $0x48] sm:$0xff] %vm375_vm2, %v2219_v60  ;;  %v2554_v42 = vpop.f32.mrb[10].mxu1  ;;  %v2629_v60 = vld [vmem:[%s2769_s9 + $0xc8] sm:$0xff] }
 0x270   : > { %2250 = vst.msk [vmem:[%s4029_s17 + $0x40] sm:$0xff] %vm375_vm2, %v2218_v18  ;;  %v2107_v0 = vadd.f32 %v2554_v42, %v4021_v39  ;;  %v2101_v1 = vpop.f32.mrb[11].mxu1  ;;  %v2630_v18 = vld [vmem:[%s2769_s9 + $0xc0] sm:$0xff] }
 0x271   : > { %v2102_v48 = vadd.f32 %v4021_v39, %v2101_v1 }
 0x272   : > { %v2221_v33 = vadd.f32 %v2615_v38, %v2107_v0 }
 0x273   : > { %v2220_v35 = vadd.f32 %v2616_v25, %v2102_v48  ;;  %v2557_v28 = vpop.f32.mrb[12].mxu1 }
 0x274   : > { %2253 = vst.msk [vmem:[%s4029_s17 + $0x58] sm:$0xff] %vm375_vm2, %v2221_v33  ;;  %v2117_v6 = vadd.f32 %v2557_v28, %v4021_v39  ;;  %v2111_v20 = vpop.f32.mrb[13].mxu1  ;;  %v2631_v33 = vld [vmem:[%s2769_s9 + $0xd8] sm:$0xff] }
 0x275   : > { %2252 = vst.msk [vmem:[%s4029_s17 + $0x50] sm:$0xff] %vm375_vm2, %v2220_v35  ;;  %v2112_v17 = vadd.f32 %v4021_v39, %v2111_v20  ;;  %v2632_v35 = vld [vmem:[%s2769_s9 + $0xd0] sm:$0xff] }
 0x276   : > { %v2223_v16 = vadd.f32 %v2617_v4, %v2117_v6 }
 0x277   : > { %v2222_v58 = vadd.f32 %v2618_v19, %v2112_v17 }
 0x278   : > { %2255 = vst.msk [vmem:[%s4029_s17 + $0x68] sm:$0xff] %vm375_vm2, %v2223_v16  ;;  %v2560_v50 = vpop.f32.mrb[14].mxu1  ;;  %v2633_v16 = vld [vmem:[%s2769_s9 + $0xe8] sm:$0xff] }
 0x279   : > { %2254 = vst.msk [vmem:[%s4029_s17 + $0x60] sm:$0xff] %vm375_vm2, %v2222_v58  ;;  %v2127_v40 = vadd.f32 %v2560_v50, %v4021_v39  ;;  %v2121_v57 = vpop.f32.mrb[15].mxu1  ;;  %v2634_v58 = vld [vmem:[%s2769_s9 + $0xe0] sm:$0xff] }
 0x27a   : > { %v2122_v46 = vadd.f32 %v4021_v39, %v2121_v57 }
 0x27b   : > { %v2225_v29 = vadd.f32 %v2619_v11, %v2127_v40 }
 0x27c   : > { %v2224_v26 = vadd.f32 %v2620_v41, %v2122_v46 }
 0x27d   : > { %v2563_v13 = vpop.f32.mrb[16].mxu1  ;;  %2257 = vst.msk [vmem:[%s4029_s17 + $0x78] sm:$0xff] %vm375_vm2, %v2225_v29  ;;  %v2635_v29 = vld [vmem:[%s2769_s9 + $0xf8] sm:$0xff] }
 0x27e   : > { %v2137_v10 = vadd.f32 %v2563_v13, %v4021_v39  ;;  %v2131_v36 = vpop.f32.mrb[17].mxu1  ;;  %2256 = vst.msk [vmem:[%s4029_s17 + $0x70] sm:$0xff] %vm375_vm2, %v2224_v26  ;;  %v2636_v26 = vld [vmem:[%s2769_s9 + $0xf0] sm:$0xff] }
 0x27f   : > { %v2132_v53 = vadd.f32 %v4021_v39, %v2131_v36 }
 0x280   : > { %v2227_v21 = vadd.f32 %v2621_v8, %v2137_v10 }
 0x281   : > { %v2226_v14 = vadd.f32 %v2622_v45, %v2132_v53  ;;  %v2566_v44 = vpop.f32.mrb[18].mxu1 }
 0x282   : > { %2259 = vst.msk [vmem:[%s4029_s17 + $0x88] sm:$0xff] %vm375_vm2, %v2227_v21  ;;  %v2147_v31 = vadd.f32 %v2566_v44, %v4021_v39  ;;  %v2141_v24 = vpop.f32.mrb[19].mxu1 }
 0x283   : > { %2258 = vst.msk [vmem:[%s4029_s17 + $0x80] sm:$0xff] %vm375_vm2, %v2226_v14  ;;  %v2142_v22 = vadd.f32 %v4021_v39, %v2141_v24 }
 0x284   : > { %v2229_v56 = vadd.f32 %v2623_v32, %v2147_v31 }
 0x285   : > { %v2228_v12 = vadd.f32 %v2624_v47, %v2142_v22  ;;  %v2569_v62 = vpop.f32.mrb[20].mxu1 }
 0x286   : > { %2261 = vst.msk [vmem:[%s4029_s17 + $0x98] sm:$0xff] %vm375_vm2, %v2229_v56  ;;  %v2157_v55 = vadd.f32 %v2569_v62, %v4021_v39  ;;  %v2151_v23 = vpop.f32.mrb[21].mxu1 }
 0x287   : > { %2260 = vst.msk [vmem:[%s4029_s17 + $0x90] sm:$0xff] %vm375_vm2, %v2228_v12  ;;  %v2152_v7 = vadd.f32 %v4021_v39, %v2151_v23 }
 0x288   : > { %v2231_v59 = vadd.f32 %v2625_v30, %v2157_v55 }
 0x289   : > { %v2230_v54 = vadd.f32 %v2626_v15, %v2152_v7  ;;  %v2572_v63 = vpop.f32.mrb[22].mxu1 }
 0x28a   : > { %2263 = vst.msk [vmem:[%s4029_s17 + $0xa8] sm:$0xff] %vm375_vm2, %v2231_v59  ;;  %v2167_v37 = vadd.f32 %v2572_v63, %v4021_v39  ;;  %v2161_v27 = vpop.f32.mrb[23].mxu1 }
 0x28b   : > { %2262 = vst.msk [vmem:[%s4029_s17 + $0xa0] sm:$0xff] %vm375_vm2, %v2230_v54  ;;  %v2162_v5 = vadd.f32 %v4021_v39, %v2161_v27 }
 0x28c   : > { %v2233_v43 = vadd.f32 %v2627_v61, %v2167_v37 }
 0x28d   : > { %v2232_v49 = vadd.f32 %v2628_v2, %v2162_v5  ;;  %v2575_v9 = vpop.f32.mrb[24].mxu1 }
 0x28e   : > { %2265 = vst.msk [vmem:[%s4029_s17 + $0xb8] sm:$0xff] %vm375_vm2, %v2233_v43  ;;  %v2177_v52 = vadd.f32 %v2575_v9, %v4021_v39  ;;  %v2171_v3 = vpop.f32.mrb[25].mxu1 }
 0x28f   : > { %2264 = vst.msk [vmem:[%s4029_s17 + $0xb0] sm:$0xff] %vm375_vm2, %v2232_v49  ;;  %v2172_v51 = vadd.f32 %v4021_v39, %v2171_v3 }
 0x290   : > { %v2235_v34 = vadd.f32 %v2629_v60, %v2177_v52 }
 0x291   : > { %v2234_v42 = vadd.f32 %v2630_v18, %v2172_v51  ;;  %v2578_v0 = vpop.f32.mrb[26].mxu1 }
 0x292   : > { %2267 = vst.msk [vmem:[%s4029_s17 + $0xc8] sm:$0xff] %vm375_vm2, %v2235_v34  ;;  %v2187_v1 = vadd.f32 %v2578_v0, %v4021_v39  ;;  %v2181_v48 = vpop.f32.mrb[27].mxu1 }
 0x293   : > { %2266 = vst.msk [vmem:[%s4029_s17 + $0xc0] sm:$0xff] %vm375_vm2, %v2234_v42  ;;  %v2182_v38 = vadd.f32 %v4021_v39, %v2181_v48 }
 0x294   : > { %v2237_v25 = vadd.f32 %v2631_v33, %v2187_v1 }
 0x295   : > { %v2236_v28 = vadd.f32 %v2632_v35, %v2182_v38  ;;  %v2581_v6 = vpop.f32.mrb[28].mxu1 }
 0x296   : > { %2269 = vst.msk [vmem:[%s4029_s17 + $0xd8] sm:$0xff] %vm375_vm2, %v2237_v25  ;;  %v2197_v20 = vadd.f32 %v2581_v6, %v4021_v39  ;;  %v2191_v17 = vpop.f32.mrb[29].mxu1 }
 0x297   : > { %2268 = vst.msk [vmem:[%s4029_s17 + $0xd0] sm:$0xff] %vm375_vm2, %v2236_v28  ;;  %v2192_v4 = vadd.f32 %v4021_v39, %v2191_v17 }
 0x298   : > { %v2239_v19 = vadd.f32 %v2633_v16, %v2197_v20 }
 0x299   : > { %v2238_v50 = vadd.f32 %v2634_v58, %v2192_v4  ;;  %v2584_v40 = vpop.f32.mrb[30].mxu1 }
 0x29a   : > { %2271 = vst.msk [vmem:[%s4029_s17 + $0xe8] sm:$0xff] %vm375_vm2, %v2239_v19  ;;  %v2207_v57 = vadd.f32 %v2584_v40, %v4021_v39  ;;  %v2201_v46 = vpop.f32.mrb[31].mxu1 }
 0x29b   : > { %2270 = vst.msk [vmem:[%s4029_s17 + $0xe0] sm:$0xff] %vm375_vm2, %v2238_v50  ;;  %v2202_v11 = vadd.f32 %v4021_v39, %v2201_v46 }
 0x29c   : > { %v2241_v41 = vadd.f32 %v2635_v29, %v2207_v57 }
 0x29d   : > { %v2240_v13 = vadd.f32 %v2636_v26, %v2202_v11 }
 0x29e   : > { %2273 = vst.msk [vmem:[%s4029_s17 + $0xf8] sm:$0xff] %vm375_vm2, %v2241_v41 }
 0x29f   : > { %2272 = vst.msk [vmem:[%s4029_s17 + $0xf0] sm:$0xff] %vm375_vm2, %v2240_v13 }
 0x2a0 PF: > { %s17_s24 = sadd.s32 1, %s2643_s24  }
 0x2a1   : > { %p14_p4 = scmp.ge.s32.totalorder %s17_s24, 4  }
 0x2a3   :  { %16 = sbr.rel (!%p14_p4) target bundleno = 1 (0x1), region = 94 }

</bundles_post_ra>
